<compile_context>
chip_gen: v5e
topology: v5e:2x2
jax: 0.10.0
libtpu: 0.0.40
codegen_flags: <defaults>
</compile_context>

<pallas_src>
from functools import partial

import jax
import jax.numpy as jnp
import numpy as np
from jax import lax
from jax.experimental import pallas as pl
from jax.experimental.pallas import tpu as pltpu


def _st_attn_kernel(x1_ref, x2_ref, w1_ref, b1_ref, w2_ref, b2_ref,
                    ww_ref, bw_ref, o1_ref, o2_ref, *, n, ic, mxu_dtype):
    f32 = jnp.float32
    x1 = x1_ref[0]                      # (C, N)   lane-dense
    x2 = x2_ref[0]                      # (C, N)

    # Packed BN+1x1-conv projections (one matmul per stream).  Row layout:
    #   p1 = [g(x1) (IC rows); ones (1 row); theta(x1) (IC rows)]
    #   p2 = [g(x2) (IC rows); ones (1 row); phi(x2)   (IC rows)]
    # The ones row comes from a zero weight row + unit bias and is later used
    # as the softmax-denominator row of the attention matmuls.
    p1 = jnp.dot(w1_ref[...], x1, preferred_element_type=f32) + b1_ref[...]
    p2 = jnp.dot(w2_ref[...], x2, preferred_element_type=f32) + b2_ref[...]
    ga1, th1 = p1[:ic + 1], p1[ic + 1:]          # (IC+1, N), (IC, N)
    ga2, ph2 = p2[:ic + 1], p2[ic + 1:]

    # energy_space_1[i, j] = <theta(x1)[:, i], phi(x2)[:, j]>   -> (N, N)
    # Contract the channel axis (dim 0) of both operands directly; no .T
    # materialization.
    e = lax.dot_general(th1.astype(mxu_dtype), ph2.astype(mxu_dtype),
                        (((0,), (0,)), ((), ())),
                        preferred_element_type=f32)

    # Unnormalized softmax numerators (per-direction max subtraction kept for
    # nn.Softmax-equivalent numerical stability).
    m0 = jnp.max(e, axis=0, keepdims=True)       # (1, N)
    q0 = jnp.exp(e - m0)                         # softmax over x1 positions (rows)
    m1 = jnp.max(e, axis=1, keepdims=True)       # (N, 1)
    q1 = jnp.exp(e - m1)                         # softmax over x2 positions (cols)

    # Attention matmuls with the ones row carried along: the last output row
    # of each result is exactly the softmax denominator, already in lane
    # orientation, so normalization is a cheap (IC, N) multiply afterwards.
    #   z1[c, j] = sum_i ga1[c, i] * q0[i, j]
    z1 = jnp.dot(ga1.astype(mxu_dtype), q0.astype(mxu_dtype),
                 preferred_element_type=f32)                     # (IC+1, N)
    #   z2[c, i] = sum_j ga2[c, j] * q1[i, j]
    z2 = lax.dot_general(ga2.astype(mxu_dtype), q1.astype(mxu_dtype),
                         (((1,), (1,)), ((), ())),
                         preferred_element_type=f32)             # (IC+1, N)

    y1 = z1[:ic] * pl.reciprocal(z1[ic:ic + 1], approx=True)     # (IC, N)
    y2 = z2[:ic] * pl.reciprocal(z2[ic:ic + 1], approx=True)     # (IC, N)

    # Fused W head (Conv 1x1 + BN folded): one matmul over both streams.
    y = jnp.concatenate([y1, y2], axis=1)                        # (IC, 2N)
    d = jnp.dot(ww_ref[...], y, preferred_element_type=f32) + bw_ref[...]

    o1_ref[0] = x1 + d[:, :n]
    o2_ref[0] = x2 + d[:, n:]


def spatiotemporal_attention(x1, x2, params, *, mxu_dtype=jnp.float32):
    """x1, x2: (B, C, N) float32, channel-first. Returns (out1, out2) same shape."""
    B, C, N = x1.shape
    IC = params["wg"].shape[0]

    zero_row = jnp.zeros((1, C), jnp.float32)
    one_b = jnp.ones((1,), jnp.float32)

    # Packed projection weights (rows: [g; ones-producer; theta/phi]).
    w1 = jnp.concatenate([params["wg"], zero_row, params["wth"]], axis=0)       # (2IC+1, C)
    b1 = jnp.concatenate([params["bg"], one_b, params["bth"]], axis=0)[:, None]  # (2IC+1, 1)
    w2 = jnp.concatenate([params["wg"], zero_row, params["wph"]], axis=0)
    b2 = jnp.concatenate([params["bg"], one_b, params["bph"]], axis=0)[:, None]
    ww = params["ww"]                                                            # (C, IC)
    bw = params["bw"][:, None]                                                   # (C, 1)

    x_spec = pl.BlockSpec((1, C, N), lambda b: (b, 0, 0))

    def w_spec(shape):
        return pl.BlockSpec(shape, lambda b: (0, 0))

    out_sd = jax.ShapeDtypeStruct((B, C, N), jnp.float32)
    kernel = partial(_st_attn_kernel, n=N, ic=IC, mxu_dtype=mxu_dtype)

    return pl.pallas_call(
        kernel,
        out_shape=(out_sd, out_sd),
        grid_spec=pltpu.PrefetchScalarGridSpec(
            num_scalar_prefetch=0,
            grid=(B,),
            in_specs=[x_spec, x_spec,
                      w_spec(w1.shape), w_spec(b1.shape),
                      w_spec(w2.shape), w_spec(b2.shape),
                      w_spec(ww.shape), w_spec(bw.shape)],
            out_specs=(x_spec, x_spec)),
        input_output_aliases={0: 0, 1: 1},
        compiler_params=pltpu.CompilerParams(
            dimension_semantics=("parallel",)),
    )(x1, x2, w1, b1, w2, b2, ww, bw)


# ---------------- parameter construction (BN folding) ----------------

_EPS = 1e-5


def fold_bn_then_conv(gamma, beta, mean, var, conv_w, conv_b):
    """nn.Sequential(BatchNorm2d(Cin), Conv2d(Cin, OC, 1)) -> (w (OC, Cin), b (OC,))."""
    s = gamma / jnp.sqrt(var + _EPS)
    t = beta - mean * s
    w_eff = conv_w * s[None, :]
    b_eff = conv_b + conv_w @ t
    return w_eff.astype(jnp.float32), b_eff.astype(jnp.float32)


def fold_conv_then_bn(conv_w, conv_b, gamma, beta, mean, var):
    """nn.Sequential(Conv2d(IC, C, 1), BatchNorm2d(C)) -> (w (C, IC), b (C,))."""
    s = gamma / jnp.sqrt(var + _EPS)
    w_eff = conv_w * s[:, None]
    b_eff = (conv_b - mean) * s + beta
    return w_eff.astype(jnp.float32), b_eff.astype(jnp.float32)


def make_params(key, C, IC):
    ks = jax.random.split(key, 24)
    it = iter(list(ks))

    def conv(oc, ic):
        return (0.2 * jax.random.normal(next(it), (oc, ic), jnp.float32),
                0.1 * jax.random.normal(next(it), (oc,), jnp.float32))

    def bn(c):
        gamma = 1.0 + 0.1 * jax.random.normal(next(it), (c,), jnp.float32)
        beta = 0.1 * jax.random.normal(next(it), (c,), jnp.float32)
        mean = 0.1 * jax.random.normal(next(it), (c,), jnp.float32)
        var = 1.0 + 0.2 * jax.random.uniform(next(it), (c,), jnp.float32)
        return gamma, beta, mean, var

    p = {}
    p["wg"], p["bg"] = fold_bn_then_conv(*bn(C), *conv(IC, C))     # g:     BN -> Conv
    p["wth"], p["bth"] = fold_bn_then_conv(*bn(C), *conv(IC, C))   # theta: BN -> Conv
    p["wph"], p["bph"] = fold_bn_then_conv(*bn(C), *conv(IC, C))   # phi:   BN -> Conv
    p["ww"], p["bw"] = fold_conv_then_bn(*conv(C, IC), *bn(C))     # W:     Conv -> BN
    return p


# ---------------- pure-JAX reference (same math, no Pallas) ----------------

def reference(x1, x2, p):
    def proj(x, w, b):                      # x: (B, Cin, N), w: (OC, Cin)
        return jnp.einsum("oc,bcn->bon", w, x) + b[None, :, None]
    g1 = proj(x1, p["wg"], p["bg"])
    g2 = proj(x2, p["wg"], p["bg"])
    th1 = proj(x1, p["wth"], p["bth"])
    ph2 = proj(x2, p["wph"], p["bph"])
    e = jnp.einsum("bci,bcj->bij", th1, ph2)          # energy_space_1
    s2 = jax.nn.softmax(e, axis=1)                    # over x1 positions
    r = jax.nn.softmax(e, axis=2)                     # over x2 positions
    y1 = jnp.einsum("bci,bij->bcj", g1, s2)
    y2 = jnp.einsum("bcj,bij->bci", g2, r)
    o1 = x1 + proj(y1, p["ww"], p["bw"])
    o2 = x2 + proj(y2, p["ww"], p["bw"])
    return o1, o2


if __name__ == "__main__":
    B, C, H, W = 2, 4, 16, 16
    IC = C // 2
    N = H * W

    key = jax.random.PRNGKey(0)
    kx1, kx2, kp = jax.random.split(key, 3)

    # inputs in PyTorch NCHW convention
    x1_nchw = jax.random.normal(kx1, (B, C, H, W), jnp.float32)
    x2_nchw = jax.random.normal(kx2, (B, C, H, W), jnp.float32)
    params = make_params(kp, C, IC)

    # NCHW -> (B, C, N): pure reshape, no transpose (lane-dense channel-first).
    x1 = x1_nchw.reshape(B, C, N)
    x2 = x2_nchw.reshape(B, C, N)

    # Reference computed first: x1/x2 are donated to the kernel call below so
    # the input->output aliasing is a genuine in-place update.
    ref1, ref2 = jax.block_until_ready(reference(x1, x2, params))

    fn = jax.jit(spatiotemporal_attention, donate_argnums=(0, 1))
    out1, out2 = jax.block_until_ready(fn(x1, x2, params))

    # back to NCHW (pure reshape, matches PyTorch module output convention)
    out1_nchw = out1.reshape(B, C, H, W)
    out2_nchw = out2.reshape(B, C, H, W)

    # Tolerance relaxed from 1e-5 because of the EUP approx-reciprocal softmax
    # denominators; any structural/math bug would produce O(0.1-1) errors.
    np.testing.assert_allclose(np.asarray(out1), np.asarray(ref1), rtol=5e-3, atol=5e-3)
    np.testing.assert_allclose(np.asarray(out2), np.asarray(ref2), rtol=5e-3, atol=5e-3)

    print("KERNEL_OK")
</pallas_src>

<mosaic_0001>
module attributes {stable_mosaic.version = 11 : i64} {
  func.func @_st_attn_kernel(%arg0: i32, %arg1: memref<1x4x256xf32, #tpu.memory_space<vmem>>, %arg2: memref<1x4x256xf32, #tpu.memory_space<vmem>>, %arg3: memref<5x4xf32, #tpu.memory_space<vmem>>, %arg4: memref<5x1xf32, #tpu.memory_space<vmem>>, %arg5: memref<5x4xf32, #tpu.memory_space<vmem>>, %arg6: memref<5x1xf32, #tpu.memory_space<vmem>>, %arg7: memref<4x2xf32, #tpu.memory_space<vmem>>, %arg8: memref<4x1xf32, #tpu.memory_space<vmem>>, %arg9: memref<1x4x256xf32, #tpu.memory_space<vmem>>, %arg10: memref<1x4x256xf32, #tpu.memory_space<vmem>>) attributes {dimension_semantics = [#tpu.dimension_semantics<parallel>], iteration_bounds = array<i64: 2>, scalar_prefetch = 0 : i64, scratch_operands = 0 : i64, tpu.core_type = #tpu.core_type<tc>, window_params = [{transform_indices = @transform_0, window_bounds = array<i64: 1, 4, 256>}, {transform_indices = @transform_1, window_bounds = array<i64: 1, 4, 256>}, {pipeline_mode = #tpu.pipeline_mode<synchronous>, transform_indices = @transform_2, window_bounds = array<i64: 5, 4>}, {pipeline_mode = #tpu.pipeline_mode<synchronous>, transform_indices = @transform_3, window_bounds = array<i64: 5, 1>}, {pipeline_mode = #tpu.pipeline_mode<synchronous>, transform_indices = @transform_4, window_bounds = array<i64: 5, 4>}, {pipeline_mode = #tpu.pipeline_mode<synchronous>, transform_indices = @transform_5, window_bounds = array<i64: 5, 1>}, {pipeline_mode = #tpu.pipeline_mode<synchronous>, transform_indices = @transform_6, window_bounds = array<i64: 4, 2>}, {pipeline_mode = #tpu.pipeline_mode<synchronous>, transform_indices = @transform_7, window_bounds = array<i64: 4, 1>}, {transform_indices = @transform_8, window_bounds = array<i64: 1, 4, 256>}, {transform_indices = @transform_9, window_bounds = array<i64: 1, 4, 256>}]} {
    %c0 = arith.constant 0 : index
    %c0_0 = arith.constant 0 : index
    %c0_1 = arith.constant 0 : index
    %0 = vector.load %arg1[%c0, %c0_0, %c0_1] : memref<1x4x256xf32, #tpu.memory_space<vmem>>, vector<1x4x256xf32>
    %1 = vector.shape_cast %0 : vector<1x4x256xf32> to vector<4x256xf32>
    %c0_2 = arith.constant 0 : index
    %c0_3 = arith.constant 0 : index
    %c0_4 = arith.constant 0 : index
    %2 = vector.load %arg2[%c0_2, %c0_3, %c0_4] : memref<1x4x256xf32, #tpu.memory_space<vmem>>, vector<1x4x256xf32>
    %3 = vector.shape_cast %2 : vector<1x4x256xf32> to vector<4x256xf32>
    %c0_5 = arith.constant 0 : index
    %c0_6 = arith.constant 0 : index
    %4 = vector.load %arg3[%c0_5, %c0_6] : memref<5x4xf32, #tpu.memory_space<vmem>>, vector<5x4xf32>
    %cst = arith.constant dense<0.000000e+00> : vector<5x256xf32>
    %5 = tpu.matmul %4, %1, %cst {dimension_numbers = #tpu.dot_dimension_numbers<[1], [0], [0], [1], [0, 0, 1, 1], [], []>} : vector<5x4xf32>, vector<4x256xf32>, vector<5x256xf32> -> vector<5x256xf32>
    %c0_7 = arith.constant 0 : index
    %c0_8 = arith.constant 0 : index
    %6 = vector.load %arg4[%c0_7, %c0_8] : memref<5x1xf32, #tpu.memory_space<vmem>>, vector<5x1xf32>
    %7 = vector.broadcast %6 : vector<5x1xf32> to vector<5x256xf32>
    %8 = arith.addf %5, %7 : vector<5x256xf32>
    %c0_9 = arith.constant 0 : index
    %c0_10 = arith.constant 0 : index
    %9 = vector.load %arg5[%c0_9, %c0_10] : memref<5x4xf32, #tpu.memory_space<vmem>>, vector<5x4xf32>
    %cst_11 = arith.constant dense<0.000000e+00> : vector<5x256xf32>
    %10 = tpu.matmul %9, %3, %cst_11 {dimension_numbers = #tpu.dot_dimension_numbers<[1], [0], [0], [1], [0, 0, 1, 1], [], []>} : vector<5x4xf32>, vector<4x256xf32>, vector<5x256xf32> -> vector<5x256xf32>
    %c0_12 = arith.constant 0 : index
    %c0_13 = arith.constant 0 : index
    %11 = vector.load %arg6[%c0_12, %c0_13] : memref<5x1xf32, #tpu.memory_space<vmem>>, vector<5x1xf32>
    %12 = vector.broadcast %11 : vector<5x1xf32> to vector<5x256xf32>
    %13 = arith.addf %10, %12 : vector<5x256xf32>
    %14 = vector.extract_strided_slice %8 {offsets = [0, 0], sizes = [3, 256], strides = [1, 1]} : vector<5x256xf32> to vector<3x256xf32>
    %15 = vector.extract_strided_slice %8 {offsets = [3, 0], sizes = [2, 256], strides = [1, 1]} : vector<5x256xf32> to vector<2x256xf32>
    %16 = vector.extract_strided_slice %13 {offsets = [0, 0], sizes = [3, 256], strides = [1, 1]} : vector<5x256xf32> to vector<3x256xf32>
    %17 = vector.extract_strided_slice %13 {offsets = [3, 0], sizes = [2, 256], strides = [1, 1]} : vector<5x256xf32> to vector<2x256xf32>
    %cst_14 = arith.constant dense<0.000000e+00> : vector<256x256xf32>
    %18 = tpu.matmul %15, %17, %cst_14 {dimension_numbers = #tpu.dot_dimension_numbers<[0], [0], [1], [1], [0, 1, 1, 1], [], []>} : vector<2x256xf32>, vector<2x256xf32>, vector<256x256xf32> -> vector<256x256xf32>
    %cst_15 = arith.constant dense<0xFF800000> : vector<256xf32>
    %19 = vector.multi_reduction <maximumf>, %18, %cst_15 [0] : vector<256x256xf32> to vector<256xf32>
    %20 = vector.shape_cast %19 : vector<256xf32> to vector<1x256xf32>
    %21 = vector.broadcast %20 : vector<1x256xf32> to vector<256x256xf32>
    %22 = arith.subf %18, %21 : vector<256x256xf32>
    %23 = math.exp %22 : vector<256x256xf32>
    %cst_16 = arith.constant dense<0xFF800000> : vector<256xf32>
    %24 = vector.multi_reduction <maximumf>, %18, %cst_16 [1] : vector<256x256xf32> to vector<256xf32>
    %25 = vector.shape_cast %24 : vector<256xf32> to vector<256x1xf32>
    %26 = vector.broadcast %25 : vector<256x1xf32> to vector<256x256xf32>
    %27 = arith.subf %18, %26 : vector<256x256xf32>
    %28 = math.exp %27 : vector<256x256xf32>
    %cst_17 = arith.constant dense<0.000000e+00> : vector<3x256xf32>
    %29 = tpu.matmul %14, %23, %cst_17 {dimension_numbers = #tpu.dot_dimension_numbers<[1], [0], [0], [1], [0, 0, 1, 1], [], []>} : vector<3x256xf32>, vector<256x256xf32>, vector<3x256xf32> -> vector<3x256xf32>
    %cst_18 = arith.constant dense<0.000000e+00> : vector<3x256xf32>
    %30 = tpu.matmul %16, %28, %cst_18 {dimension_numbers = #tpu.dot_dimension_numbers<[1], [1], [0], [0], [0, 0, 1, 0], [], []>} : vector<3x256xf32>, vector<256x256xf32>, vector<3x256xf32> -> vector<3x256xf32>
    %31 = vector.extract_strided_slice %29 {offsets = [0, 0], sizes = [2, 256], strides = [1, 1]} : vector<3x256xf32> to vector<2x256xf32>
    %32 = vector.extract_strided_slice %29 {offsets = [2, 0], sizes = [1, 256], strides = [1, 1]} : vector<3x256xf32> to vector<1x256xf32>
    %33 = tpu.reciprocal %32 {approx = true} : vector<1x256xf32> -> vector<1x256xf32>
    %34 = vector.broadcast %33 : vector<1x256xf32> to vector<2x256xf32>
    %35 = arith.mulf %31, %34 : vector<2x256xf32>
    %36 = vector.extract_strided_slice %30 {offsets = [0, 0], sizes = [2, 256], strides = [1, 1]} : vector<3x256xf32> to vector<2x256xf32>
    %37 = vector.extract_strided_slice %30 {offsets = [2, 0], sizes = [1, 256], strides = [1, 1]} : vector<3x256xf32> to vector<1x256xf32>
    %38 = tpu.reciprocal %37 {approx = true} : vector<1x256xf32> -> vector<1x256xf32>
    %39 = vector.broadcast %38 : vector<1x256xf32> to vector<2x256xf32>
    %40 = arith.mulf %36, %39 : vector<2x256xf32>
    %41 = tpu.concatenate %35, %40 in 1 : vector<2x256xf32>, vector<2x256xf32> -> vector<2x512xf32>
    %c0_19 = arith.constant 0 : index
    %c0_20 = arith.constant 0 : index
    %42 = vector.load %arg7[%c0_19, %c0_20] : memref<4x2xf32, #tpu.memory_space<vmem>>, vector<4x2xf32>
    %cst_21 = arith.constant dense<0.000000e+00> : vector<4x512xf32>
    %43 = tpu.matmul %42, %41, %cst_21 {dimension_numbers = #tpu.dot_dimension_numbers<[1], [0], [0], [1], [0, 0, 1, 1], [], []>} : vector<4x2xf32>, vector<2x512xf32>, vector<4x512xf32> -> vector<4x512xf32>
    %c0_22 = arith.constant 0 : index
    %c0_23 = arith.constant 0 : index
    %44 = vector.load %arg8[%c0_22, %c0_23] : memref<4x1xf32, #tpu.memory_space<vmem>>, vector<4x1xf32>
    %45 = vector.broadcast %44 : vector<4x1xf32> to vector<4x512xf32>
    %46 = arith.addf %43, %45 : vector<4x512xf32>
    %47 = vector.extract_strided_slice %46 {offsets = [0, 0], sizes = [4, 256], strides = [1, 1]} : vector<4x512xf32> to vector<4x256xf32>
    %48 = arith.addf %1, %47 : vector<4x256xf32>
    %c0_24 = arith.constant 0 : index
    %c0_25 = arith.constant 0 : index
    %c0_26 = arith.constant 0 : index
    %49 = vector.load %arg9[%c0_24, %c0_25, %c0_26] : memref<1x4x256xf32, #tpu.memory_space<vmem>>, vector<1x4x256xf32>
    %50 = vector.shape_cast %49 : vector<1x4x256xf32> to vector<4x256xf32>
    %51 = vector.shape_cast %48 : vector<4x256xf32> to vector<1x4x256xf32>
    tpu.vector_store %arg9[%c0_24, %c0_25, %c0_26], %51 {strides = array<i32>} : memref<1x4x256xf32, #tpu.memory_space<vmem>>, vector<1x4x256xf32>,
    %52 = vector.extract_strided_slice %46 {offsets = [0, 256], sizes = [4, 256], strides = [1, 1]} : vector<4x512xf32> to vector<4x256xf32>
    %53 = arith.addf %3, %52 : vector<4x256xf32>
    %c0_27 = arith.constant 0 : index
    %c0_28 = arith.constant 0 : index
    %c0_29 = arith.constant 0 : index
    %54 = vector.load %arg10[%c0_27, %c0_28, %c0_29] : memref<1x4x256xf32, #tpu.memory_space<vmem>>, vector<1x4x256xf32>
    %55 = vector.shape_cast %54 : vector<1x4x256xf32> to vector<4x256xf32>
    %56 = vector.shape_cast %53 : vector<4x256xf32> to vector<1x4x256xf32>
    tpu.vector_store %arg10[%c0_27, %c0_28, %c0_29], %56 {strides = array<i32>} : memref<1x4x256xf32, #tpu.memory_space<vmem>>, vector<1x4x256xf32>,
    return
  }
  func.func @transform_0(%arg0: i32) -> (i32, i32, i32) {
    %c0_i32 = arith.constant 0 : i32
    %c0_i32_0 = arith.constant 0 : i32
    %c0_i32_1 = arith.constant 0 : i32
    return %arg0, %c0_i32, %c0_i32_0 : i32, i32, i32
  }
  func.func @transform_1(%arg0: i32) -> (i32, i32, i32) {
    %c0_i32 = arith.constant 0 : i32
    %c0_i32_0 = arith.constant 0 : i32
    %c0_i32_1 = arith.constant 0 : i32
    return %arg0, %c0_i32, %c0_i32_0 : i32, i32, i32
  }
  func.func @transform_2(%arg0: i32) -> (i32, i32) {
    %c0_i32 = arith.constant 0 : i32
    %c0_i32_0 = arith.constant 0 : i32
    %c0_i32_1 = arith.constant 0 : i32
    return %c0_i32, %c0_i32_0 : i32, i32
  }
  func.func @transform_3(%arg0: i32) -> (i32, i32) {
    %c0_i32 = arith.constant 0 : i32
    %c0_i32_0 = arith.constant 0 : i32
    %c0_i32_1 = arith.constant 0 : i32
    return %c0_i32, %c0_i32_0 : i32, i32
  }
  func.func @transform_4(%arg0: i32) -> (i32, i32) {
    %c0_i32 = arith.constant 0 : i32
    %c0_i32_0 = arith.constant 0 : i32
    %c0_i32_1 = arith.constant 0 : i32
    return %c0_i32, %c0_i32_0 : i32, i32
  }
  func.func @transform_5(%arg0: i32) -> (i32, i32) {
    %c0_i32 = arith.constant 0 : i32
    %c0_i32_0 = arith.constant 0 : i32
    %c0_i32_1 = arith.constant 0 : i32
    return %c0_i32, %c0_i32_0 : i32, i32
  }
  func.func @transform_6(%arg0: i32) -> (i32, i32) {
    %c0_i32 = arith.constant 0 : i32
    %c0_i32_0 = arith.constant 0 : i32
    %c0_i32_1 = arith.constant 0 : i32
    return %c0_i32, %c0_i32_0 : i32, i32
  }
  func.func @transform_7(%arg0: i32) -> (i32, i32) {
    %c0_i32 = arith.constant 0 : i32
    %c0_i32_0 = arith.constant 0 : i32
    %c0_i32_1 = arith.constant 0 : i32
    return %c0_i32, %c0_i32_0 : i32, i32
  }
  func.func @transform_8(%arg0: i32) -> (i32, i32, i32) {
    %c0_i32 = arith.constant 0 : i32
    %c0_i32_0 = arith.constant 0 : i32
    %c0_i32_1 = arith.constant 0 : i32
    return %arg0, %c0_i32, %c0_i32_0 : i32, i32, i32
  }
  func.func @transform_9(%arg0: i32) -> (i32, i32, i32) {
    %c0_i32 = arith.constant 0 : i32
    %c0_i32_0 = arith.constant 0 : i32
    %c0_i32_1 = arith.constant 0 : i32
    return %arg0, %c0_i32, %c0_i32_0 : i32, i32, i32
  }
}

</mosaic_0001>

<bundles_post_ra>
// kernel: spatiotemporal_attention.1
= control target key start
LH: loop header
LB: loop body
LE: loop exit
PB: predicated region body
PF: predicated region fallthrough
CT: control target
= control target key end

     0   :  { %s3413_s0 = inlined_call_operand.hbm [shape: f32[2,4,256], index: 0, kind: input, shape index: {}, may-alias: {0,8}]   ;;  %s3414_s1 = inlined_call_operand.hbm [shape: f32[2,4,256], index: 1, kind: input, shape index: {}, may-alias: {1,9}]   ;;  %s3415_s2 = inlined_call_operand.vmem [shape: f32[5,4], index: 2, kind: input, shape index: {}]   ;;  %s3416_s3 = inlined_call_operand.vmem [shape: f32[5,1], index: 3, kind: input, shape index: {}]   ;;  %s3417_s4 = inlined_call_operand.vmem [shape: f32[5,4], index: 4, kind: input, shape index: {}]   ;;  %s3418_s5 = inlined_call_operand.vmem [shape: f32[5,1], index: 5, kind: input, shape index: {}]   ;;  %s3419_s6 = inlined_call_operand.vmem [shape: f32[4,2], index: 6, kind: input, shape index: {}]   ;;  %s3420_s7 = inlined_call_operand.vmem [shape: f32[4,1], index: 7, kind: input, shape index: {}]   ;;  %s3421_s8 = inlined_call_operand.hbm [shape: f32[2,4,256], index: 8, kind: output, shape index: {0}, may-alias: {0,8}]   ;;  %s3422_s9 = inlined_call_operand.hbm [shape: f32[2,4,256], index: 9, kind: output, shape index: {1}, may-alias: {1,9}]  }
   0x1   :  { %3502 = sst [smem:[#allocation66_spill]] %s3413_s0 }
   0x2   :  { %15 = vsyncpa [#allocation3], 0 }
   0x3   :  { %17 = vsyncpa [#allocation3 + $0x1], 0 }
   0x4   :  { %18 = vsyncpa [#allocation6], 0 }
   0x5   :  { %20 = vsyncpa [#allocation6 + $0x1], 0 }
   0x6   :  { %21 = vsyncpa [#allocation4], 0 }
   0x7   :  { %23 = vsyncpa [#allocation4 + $0x1], 0 }
   0x8   :  { %24 = vsyncpa [#allocation9], 0 }
   0x9   :  { %26 = vsyncpa [#allocation9 + $0x1], 0  ;;  %s2575_s30 = smov 0   ;;  %s2577_s10 = smov 0  }
   0xa   :  { %s2579_s11 = smov 0   ;;  %s2581_s12 = smov 0  }
   0xb LB: > { %3503 = sst [smem:[#allocation14_spill]] %s2510_s30  ;;  %s2596_s13 = sadd.s32 4294967295, %s2522_s12   ;;  %s2522_s12 = sphi %s2581_s12, %s3624_s12   ;;  %s2518_s11 = sphi %s2579_s11, %s3626_s11   ;;  %s2514_s10 = sphi %s2577_s10, %s3628_s10   ;;  %s2510_s30 = sphi %s2575_s30, %s3627_s30  }
   0xc   : > { %3504 = sst [smem:[#allocation15_spill]] %s2518_s11  ;;  %s1929_s14 = sadd.s32 4294967294, %s2522_s12  }
   0xd   : > { %s2600_s15 = sadd.s32 1, %s2522_s12   ;;  %s39_s16 = sadd.s32 1, %s2518_s11 }
   0xe   : > { %3505 = sst [smem:[#allocation16_spill]] %s2600_s15  ;;  %s36_s17 = ssub.s32 %s2522_s12, %s2600_s15 }
   0xf   : > { %p46_p0 = scmp.ne.s32.totalorder %s2518_s11, %s2514_s10  ;;  %p37_p1 = scmp.eq.s32.totalorder %s36_s17, 0 }
  0x10   : > { %p47_p2 = scmp.eq.s32.totalorder %s2522_s12, 0  ;;  %p52_p3 = scmp.ne.s32.totalorder %s2514_s10, %s2510_s30 }
  0x11   : > { %p53_p4 = scmp.eq.s32.totalorder %s2596_s13, 0  ;;  %p228_p7 = scmp.eq.s32.totalorder %s2596_s13, 1 }
  0x12   : > { %s2612_s18 = scalar_select %p37_p1, %s2518_s11, %s39_s16  }
  0x13   : > { %p2614_p5 = por %p47_p2, %p46_p0  ;;  %p2618_p6 = por %p53_p4, %p52_p3 }
  0x14   : > { %3506 = sst [smem:[#allocation17_spill]] %s2612_s18  ;;  %p234_p8 = scmp.eq.s32.totalorder %s1929_s14, 1 }
  0x15   : > { %p2059_p10 = scmp.lt.s32.totalorder %s2522_s12, 2  ;;  %p2625_p11 = por %p228_p7, %p46_p0 }
  0x16   : > { %p2629_p12 = por %p234_p8, %p52_p3  ;;  %s2634_s23 = sand.u32 1, %s2518_s11  }
  0x17   : > { %s2033_s24 = sshll.u32 %s2522_s12, 3  ;;  %s1932_s25 = sshll.u32 %s2634_s23, 3 }
  0x18   : > { %s3510_s22 = scalar_select %p2629_p12, 1, 0 }
  0x19   : > { %s3512_s0 = sld [smem:[#allocation66_spill]]  ;;  %s302_s14 = scalar_lea.vmem [#allocation2], %s1932_s25 }
  0x1a   : > { %3511 = sst [smem:[#allocation18_spill]] %s3510_s22  ;;  %s311_s16 = sshll.u32 %s302_s14, 4  ;;  %s312_s16 = int_to_ptr.vmem [resolvable:$true] %s311_s16 }
  0x1b   : > { %p2643_p13 = pnand %p2059_p10, %p2614_p5  ;;  %p1938_p0 = scmp.ge.s32.totalorder %s2522_s12, 1 }
  0x1c   : > { %p336_p1 = scmp.lt.s32.totalorder %s2522_s12, 3  ;;  %s299_s18 = scalar_lea.sflag [#allocation3], %s2634_s23 }
  0x1d   : > { %p2364_p3 = pneg %p2643_p13 }
  0x1f   : > { %s307_s28 = scalar_lea.hbm %s3512_s0, %s2033_s24  ;;  %s2367_s27 = scalar_lea.hbm %s3512_s0, 16 }
  0x20   : > { %s309_s29 = sshll.u32 %s307_s28, 4  ;;  %s310_s29 = int_to_ptr.hbm [resolvable:$true] %s309_s29 }
  0x21   : > { %s2360_s11 = sshra.s32 %s310_s29, 4  ;;  %s2361_s11 = int_to_ptr.hbm [resolvable:$true] %s2360_s11 }
  0x22   : > { %s2362_s15 = scalar_lea.hbm %s2361_s11, 8  ;;  %p2368_p5 = scmp.lt.s32.totalorder %s2361_s11, %s3512_s0 }
  0x23   : > { %p2363_p2 = scmp.ne.s32.totalorder %s2361_s11, %s2362_s15  ;;  %p2369_p8 = scmp.lt.s32.totalorder %s2367_s27, %s2362_s15 }
  0x25   : > { %p2365_p4 = pnand %p2364_p3, %p2363_p2  ;;  %p2370_p10 = por %p2369_p8, %p2368_p5 }
  0x27   : > { %p2366_p7 = pneg %p2365_p4 }
  0x29   : > { %p2371_p9 = pnand %p2370_p10, %p2366_p7 }
  0x2b   : > { %2374 = shalt.err (!%p2371_p9)
}
  0x2c   : > { %2048 = dma.hbm_to_vmem [thread:$0]  (!%p2643_p13), %s310_s29, 128, %s312_s16, %s299_s18  }
  0x2d   : > { %p2667_p2 = pnand %p1938_p0, %p336_p1  ;;  %s327_s11 = scalar_lea.hbm %s3414_s1, %s2033_s24 }
  0x2e   : > { %s329_s15 = sshll.u32 %s327_s11, 4  ;;  %s322_s27 = scalar_lea.vmem [#allocation5], %s1932_s25  ;;  %s330_s15 = int_to_ptr.hbm [resolvable:$true] %s329_s15 }
  0x2f   : > { %s331_s14 = sshll.u32 %s322_s27, 4  ;;  %s319_s0 = scalar_lea.sflag [#allocation6], %s2634_s23  ;;  %s332_s14 = int_to_ptr.vmem [resolvable:$true] %s331_s14 }
  0x30   : > { %s2390_s22 = sshra.s32 %s330_s15, 4  ;;  %s2397_s16 = scalar_lea.hbm %s3414_s1, 16  ;;  %s2391_s22 = int_to_ptr.hbm [resolvable:$true] %s2390_s22 }
  0x31   : > { %s2392_s30 = scalar_lea.hbm %s2391_s22, 8  ;;  %p2398_p4 = scmp.lt.s32.totalorder %s2391_s22, %s3414_s1 }
  0x32   : > { %p2393_p9 = scmp.ne.s32.totalorder %s2391_s22, %s2392_s30  ;;  %p2399_p7 = scmp.lt.s32.totalorder %s2397_s16, %s2392_s30 }
  0x34   : > { %p2395_p0 = pnand %p2393_p9, %p2364_p3  ;;  %p2400_p5 = por %p2399_p7, %p2398_p4 }
  0x36   : > { %p2396_p1 = pneg %p2395_p0 }
  0x38   : > { %p2401_p8 = pnand %p2400_p5, %p2396_p1 }
  0x3a   : > { %2404 = shalt.err (!%p2401_p8)
}
  0x3b   : > { %2051 = dma.hbm_to_vmem [thread:$0]  (!%p2643_p13), %s330_s15, 128, %s332_s14, %s319_s0  }
  0x3c   : > { %340 = sbr.rel (%p2667_p2) target bundleno = 1300 (0x514), region = 52 }
  0x41   : > { %s2689_s23 = sand.u32 1, %s2514_s10  }
  0x42   : > { %s2692_s25 = sshll.u32 %s2689_s23, 3  ;;  %s343_s22 = scalar_lea.sflag [#allocation3], %s2689_s23 }
  0x43   : > { %s346_s30 = scalar_lea.vmem [#allocation2], %s2692_s25 }
  0x44   : > { %2493 = dma.done.wait (%p2618_p6), %s343_s22, 128  }
  0x45   : > { %2495 = vsyncadd (%p2618_p6), %s343_s22, 4294967168  ;;  %s353_s0 = scalar_lea.sflag [#allocation6], %s2689_s23  ;;  %s356_s17 = scalar_lea.vmem [#allocation5], %s2692_s25 }
  0x46   : > { %2497 = dma.done.wait (%p2618_p6), %s353_s0, 128  }
  0x47   : > { %2499 = vsyncadd (%p2618_p6), %s353_s0, 4294967168  ;;  %v2524_v0 = vmov 0   ;;  %v2706_v1 = vld [vmem:[%s346_s30] sm:$0xff]  ;;  %v405_v2 = vld [vmem:[%s3416_s3] sm:$0x1f]  ;;  %vm419_vm0 = vcmask 1043456  }
  0x48   : > { %2095 = vset.pattern.permute.xlu0 %v2524_v0  ;;  %3515 = vst [vmem:[#allocation19_spill] sm:$0xff] %v2706_v1  ;;  %v2712_v3 = vld [vmem:[%s356_s17] sm:$0xff]  ;;  %vm415_vm1 = vcmask 31744   ;;  %vm693_vm2 = vcmask 1041408   ;;  %vm596_vm3 = vcmask 15360   ;;  %s2035_s22 = sshll.u32 %s2596_s13, 3 }
  0x49   : > { %412 = vst [vmem:[#allocation1] ss:$2 sm:$0xff] %v2706_v1  ;;  %408 = vperm.xlu0 %2095, %v405_v2   ;;  %v404_v4 = vld [vmem:[%s3415_s2] sm:$0x1f]  ;;  %s1783_s17 = scalar_lea.hbm %s3421_s8, %s2035_s22  ;;  %s394_s19 = scalar_lea.vmem [#allocation7], %s2692_s25 }
  0x4a   : > { %3516 = vst [vmem:[#allocation20_spill] sm:$0xff] %v2712_v3  ;;  %v465_v5 = vld [vmem:[%s3418_s5] sm:$0x1f]  ;;  %s1785_s28 = sshll.u32 %s394_s19, 4  ;;  %s1787_s11 = sshll.u32 %s1783_s17, 4  ;;  %s1786_s28 = int_to_ptr.vmem [resolvable:$true] %s1785_s28  ;;  %s1788_s11 = int_to_ptr.hbm [resolvable:$true] %s1787_s11 }
  0x4b   : > { %v464_v8 = vld [vmem:[%s3417_s4] sm:$0x1f]  ;;  %s1767_s15 = scalar_lea.sflag [#allocation4], %s2689_s23  ;;  %s2434_s20 = sshra.s32 %s1788_s11, 4  ;;  %s2435_s20 = int_to_ptr.hbm [resolvable:$true] %s2434_s20 }
  0x4c   : > { %s2436_s27 = scalar_lea.hbm %s2435_s20, 8  ;;  %s2440_s18 = scalar_lea.hbm %s3421_s8, 16 }
  0x4d   : > { %p2437_p6 = scmp.ne.s32.totalorder %s2435_s20, %s2436_s27  ;;  %p2441_p10 = scmp.lt.s32.totalorder %s2435_s20, %s3421_s8 }
  0x4e   : > { %p2442_p2 = scmp.lt.s32.totalorder %s2440_s18, %s2436_s27 }
  0x4f   : > { %p2438_p13 = pnand %p2437_p6, %p2625_p11 }
  0x50   : > { %v413_v6 = vld.sshfl [vmem:[#allocation1] sm:$0xff pattern:$0x75316420]  ;;  %v414_v7 = vld.sshfl [vmem:[#allocation1 + $0x8] sm:$0xff pattern:$0x75316420]  ;;  %p2443_p9 = por %p2442_p2, %p2441_p10 }
  0x51   : > { %1943 = vmatpush.msk.msra.mxu2 %vm419_vm0, %v413_v6  ;;  %1945 = vmatpush.msk.msra.mxu3 %vm419_vm0, %v414_v7  ;;  %472 = vst [vmem:[#allocation1] ss:$2 sm:$0xff] %v2712_v3  ;;  %p2439_p3 = pneg %p2438_p13 }
  0x52   : > { %1944 = vmatmul.msk.f32.vlgmr.msra.gmra.mxu2 %vm415_vm1, %v404_v4  ;;  %1946 = vmatmul.msk.f32.vlgmr.msra.gmra.mxu3 %vm415_vm1, %v404_v4 }
  0x53   : > { %468 = vperm.xlu0 %2095, %v465_v5   ;;  %p2444_p0 = pnand %p2443_p9, %p2439_p3 }
  0x58   : > { %v473_v9 = vld.sshfl [vmem:[#allocation1] sm:$0xff pattern:$0x75316420]  ;;  %v474_v10 = vld.sshfl [vmem:[#allocation1 + $0x8] sm:$0xff pattern:$0x75316420] }
  0x59   : > { %1947 = vmatpush.msk.msrb.mxu2 %vm419_vm0, %v473_v9  ;;  %1949 = vmatpush.msk.msrb.mxu3 %vm419_vm0, %v474_v10 }
  0x5a   : > { %1948 = vmatmul.msk.f32.vlgmr.msrb.gmra.mxu2 %vm415_vm1, %v464_v8  ;;  %1950 = vmatmul.msk.f32.vlgmr.msrb.gmra.mxu3 %vm415_vm1, %v464_v8 }
  0xbb   : > { %v409_v11 = vpop.permute.xlu0 %408 }
  0xc5   : > { %v469_v17 = vpop.permute.xlu0 %468 }
  0xd5   : > { %v441_v12 = vpop.f32.mrf.mxu2  ;;  %v461_v13 = vpop.f32.mrf.mxu3 }
  0xd6   : > { %v2732_v14 = vadd.f32 %v441_v12, %v409_v11  ;;  %v2734_v15 = vadd.f32 %v461_v13, %v409_v11 }
  0xd8   : > { %3517 = vst [vmem:[#allocation21_spill] sm:$0xff] %v2732_v14  ;;  %v524_v16 = vrot.slane %v2732_v14, 3  ;;  %v525_v24 = vrot.slane %v2734_v15, 3 }
  0xd9   : > { %3518 = vst [vmem:[#allocation22_spill] sm:$0xff] %v2734_v15 }
  0xda   : > { %528 = vxpose.xlu1.b32.start.end [1/1] (short) %v524_v16, 128 }
  0xdd   : > { %v499_v18 = vpop.f32.mrf.mxu2  ;;  %v519_v19 = vpop.f32.mrf.mxu3 }
  0xde   : > { %v2737_v20 = vadd.f32 %v499_v18, %v469_v17  ;;  %v2739_v21 = vadd.f32 %v519_v19, %v469_v17 }
  0xe0   : > { %3519 = vst [vmem:[#allocation23_spill] sm:$0xff] %v2737_v20  ;;  %v594_v22 = vrot.slane %v2737_v20, 3  ;;  %v595_v23 = vrot.slane %v2739_v21, 3 }
  0xe1   : > { %3520 = vst [vmem:[#allocation24_spill] sm:$0xff] %v2739_v21 }
  0xe2   : > { %1951 = vmatpush.msk.msra.mxu0 %vm693_vm2, %v594_v22  ;;  %1984 = vmatpush.msk.msra.mxu1 %vm693_vm2, %v595_v23 }
 0x15a   : > { %560 = vxpose.xlu1.b32.start.end [1/1] (short) %v525_v24, 128 }
 0x17e   : > { %v544_v25 = vpop.trf.xlu1 }
 0x17f   : > { %1952 = vmatmul.msk.f32.vlgmr.msra.gmra.mxu0 %vm596_vm3, %v544_v25  ;;  %1985 = vmatmul.msk.f32.vlgmr.msra.gmra.mxu1 %vm596_vm3, %v544_v25 }
 0x186   : > { %v545_v26 = vpop.trf.xlu1 }
 0x187   : > { %1953 = vmatmul.msk.f32.gmra.mxu0 %vm596_vm3, %v545_v26  ;;  %1986 = vmatmul.msk.f32.gmra.mxu1 %vm596_vm3, %v545_v26 }
 0x18e   : > { %v546_v27 = vpop.trf.xlu1 }
 0x18f   : > { %1954 = vmatmul.msk.f32.gmra.mxu0 %vm596_vm3, %v546_v27  ;;  %1987 = vmatmul.msk.f32.gmra.mxu1 %vm596_vm3, %v546_v27 }
 0x196   : > { %v547_v28 = vpop.trf.xlu1 }
 0x197   : > { %1955 = vmatmul.msk.f32.gmra.mxu0 %vm596_vm3, %v547_v28  ;;  %1988 = vmatmul.msk.f32.gmra.mxu1 %vm596_vm3, %v547_v28 }
 0x19e   : > { %v548_v29 = vpop.trf.xlu1 }
 0x19f   : > { %1956 = vmatmul.msk.f32.gmra.mxu0 %vm596_vm3, %v548_v29  ;;  %1989 = vmatmul.msk.f32.gmra.mxu1 %vm596_vm3, %v548_v29 }
 0x1a6   : > { %v549_v30 = vpop.trf.xlu1 }
 0x1a7   : > { %1957 = vmatmul.msk.f32.gmra.mxu0 %vm596_vm3, %v549_v30  ;;  %1990 = vmatmul.msk.f32.gmra.mxu1 %vm596_vm3, %v549_v30 }
 0x1ae   : > { %v550_v31 = vpop.trf.xlu1 }
 0x1af   : > { %1958 = vmatmul.msk.f32.gmra.mxu0 %vm596_vm3, %v550_v31  ;;  %1991 = vmatmul.msk.f32.gmra.mxu1 %vm596_vm3, %v550_v31 }
 0x1b6   : > { %v551_v32 = vpop.trf.xlu1 }
 0x1b7   : > { %1959 = vmatmul.msk.f32.gmra.mxu0 %vm596_vm3, %v551_v32  ;;  %1992 = vmatmul.msk.f32.gmra.mxu1 %vm596_vm3, %v551_v32 }
 0x1be   : > { %v552_v33 = vpop.trf.xlu1 }
 0x1bf   : > { %1960 = vmatmul.msk.f32.gmra.mxu0 %vm596_vm3, %v552_v33  ;;  %1993 = vmatmul.msk.f32.gmra.mxu1 %vm596_vm3, %v552_v33 }
 0x1c6   : > { %v553_v34 = vpop.trf.xlu1 }
 0x1c7   : > { %1961 = vmatmul.msk.f32.gmra.mxu0 %vm596_vm3, %v553_v34  ;;  %1994 = vmatmul.msk.f32.gmra.mxu1 %vm596_vm3, %v553_v34 }
 0x1ce   : > { %v554_v35 = vpop.trf.xlu1 }
 0x1cf   : > { %1962 = vmatmul.msk.f32.gmra.mxu0 %vm596_vm3, %v554_v35  ;;  %1995 = vmatmul.msk.f32.gmra.mxu1 %vm596_vm3, %v554_v35 }
 0x1d6   : > { %v555_v36 = vpop.trf.xlu1 }
 0x1d7   : > { %1963 = vmatmul.msk.f32.gmra.mxu0 %vm596_vm3, %v555_v36  ;;  %1996 = vmatmul.msk.f32.gmra.mxu1 %vm596_vm3, %v555_v36 }
 0x1de   : > { %v556_v37 = vpop.trf.xlu1 }
 0x1df   : > { %1964 = vmatmul.msk.f32.gmra.mxu0 %vm596_vm3, %v556_v37  ;;  %1997 = vmatmul.msk.f32.gmra.mxu1 %vm596_vm3, %v556_v37 }
 0x1e6   : > { %v557_v38 = vpop.trf.xlu1 }
 0x1e7   : > { %1965 = vmatmul.msk.f32.gmra.mxu0 %vm596_vm3, %v557_v38  ;;  %1998 = vmatmul.msk.f32.gmra.mxu1 %vm596_vm3, %v557_v38 }
 0x1ee   : > { %v558_v39 = vpop.trf.xlu1 }
 0x1ef   : > { %1966 = vmatmul.msk.f32.gmra.mxu0 %vm596_vm3, %v558_v39  ;;  %1999 = vmatmul.msk.f32.gmra.mxu1 %vm596_vm3, %v558_v39 }
 0x1f6   : > { %v559_v40 = vpop.trf.xlu1 }
 0x1f7   : > { %1967 = vmatmul.msk.f32.gmra.mxu0 %vm596_vm3, %v559_v40  ;;  %2000 = vmatmul.msk.f32.gmra.mxu1 %vm596_vm3, %v559_v40 }
 0x1fc   : > { %v2778_v41 = vpop.f32.mrf.mxu0  ;;  %v2780_v42 = vpop.f32.mrf.mxu1 }
 0x1fd   : > { %3521 = vst [vmem:[#allocation25_spill] sm:$0xff] %v2778_v41  ;;  %v1190_v62 = vmax.f32 %v2778_v41, %v2780_v42 }
 0x1fe   : > { %3522 = vst [vmem:[#allocation26_spill] sm:$0xff] %v2780_v42  ;;  %v576_v43 = vpop.trf.xlu1 }
 0x1ff   : > { %1968 = vmatmul.msk.f32.gmra.mxu0 %vm596_vm3, %v576_v43  ;;  %2001 = vmatmul.msk.f32.gmra.mxu1 %vm596_vm3, %v576_v43 }
 0x204   : > { %v2784_v44 = vpop.f32.mrf.mxu0  ;;  %v2786_v45 = vpop.f32.mrf.mxu1 }
 0x205   : > { %3523 = vst [vmem:[#allocation27_spill] sm:$0xff] %v2784_v44 }
 0x206   : > { %v577_v46 = vpop.trf.xlu1 }
 0x207   : > { %1969 = vmatmul.msk.f32.gmra.mxu0 %vm596_vm3, %v577_v46  ;;  %2002 = vmatmul.msk.f32.gmra.mxu1 %vm596_vm3, %v577_v46 }
 0x20c   : > { %v2790_v47 = vpop.f32.mrf.mxu0  ;;  %v2792_v48 = vpop.f32.mrf.mxu1 }
 0x20d   : > { %3524 = vst [vmem:[#allocation28_spill] sm:$0xff] %v2790_v47  ;;  %v924_v1 = vmax.f32 %v2778_v41, %v2790_v47 }
 0x20e   : > { %v578_v49 = vpop.trf.xlu1 }
 0x20f   : > { %1970 = vmatmul.msk.f32.gmra.mxu0 %vm596_vm3, %v578_v49  ;;  %2003 = vmatmul.msk.f32.gmra.mxu1 %vm596_vm3, %v578_v49 }
 0x214   : > { %v2796_v50 = vpop.f32.mrf.mxu0  ;;  %v2798_v51 = vpop.f32.mrf.mxu1 }
 0x215   : > { %3525 = vst [vmem:[#allocation29_spill] sm:$0xff] %v2796_v50 }
 0x216   : > { %v579_v52 = vpop.trf.xlu1 }
 0x217   : > { %1971 = vmatmul.msk.f32.gmra.mxu0 %vm596_vm3, %v579_v52  ;;  %2004 = vmatmul.msk.f32.gmra.mxu1 %vm596_vm3, %v579_v52 }
 0x21c   : > { %v2802_v53 = vpop.f32.mrf.mxu0  ;;  %v2804_v54 = vpop.f32.mrf.mxu1 }
 0x21d   : > { %v926_v21 = vmax.f32 %v924_v1, %v2802_v53 }
 0x21e   : > { %v580_v55 = vpop.trf.xlu1 }
 0x21f   : > { %1972 = vmatmul.msk.f32.gmra.mxu0 %vm596_vm3, %v580_v55  ;;  %2005 = vmatmul.msk.f32.gmra.mxu1 %vm596_vm3, %v580_v55 }
 0x224   : > { %v2808_v56 = vpop.f32.mrf.mxu0  ;;  %v2810_v57 = vpop.f32.mrf.mxu1 }
 0x226   : > { %v581_v58 = vpop.trf.xlu1 }
 0x227   : > { %1973 = vmatmul.msk.f32.gmra.mxu0 %vm596_vm3, %v581_v58  ;;  %2006 = vmatmul.msk.f32.gmra.mxu1 %vm596_vm3, %v581_v58 }
 0x22c   : > { %v2814_v59 = vpop.f32.mrf.mxu0  ;;  %v2816_v60 = vpop.f32.mrf.mxu1 }
 0x22e   : > { %v582_v61 = vpop.trf.xlu1 }
 0x22f   : > { %1974 = vmatmul.msk.f32.gmra.mxu0 %vm596_vm3, %v582_v61  ;;  %2007 = vmatmul.msk.f32.gmra.mxu1 %vm596_vm3, %v582_v61 }
 0x232   : > { %1191 = vmax.xlane.f32.xlu1 %v1190_v62 }
 0x234   : > { %v2822_v63 = vpop.f32.mrf.mxu0  ;;  %v2824_v0 = vpop.f32.mrf.mxu1 }
 0x235   : > { %3526 = vst [vmem:[#allocation30_spill] sm:$0xff] %v2822_v63  ;;  %v1211_v2 = vmax.f32 %v2822_v63, %v2824_v0 }
 0x236   : > { %v583_v4 = vpop.trf.xlu1 }
 0x237   : > { %1212 = vmax.xlane.f32.xlu2 %v1211_v2  ;;  %1975 = vmatmul.msk.f32.gmra.mxu0 %vm596_vm3, %v583_v4 }
 0x238   : > { %2008 = vmatmul.msk.f32.gmra.mxu1 %vm596_vm3, %v583_v4 }
 0x23c   : > { %v2830_v5 = vpop.f32.mrf.mxu0  ;;  %v2832_v6 = vpop.f32.mrf.mxu1 }
 0x23d   : > { %3527 = vst [vmem:[#allocation31_spill] sm:$0xff] %v2830_v5  ;;  %v1214_v7 = vmax.f32 %v2830_v5, %v2832_v6 }
 0x23e   : > { %v584_v8 = vpop.trf.xlu1 }
 0x23f   : > { %1215 = vmax.xlane.f32.xlu2 %v1214_v7  ;;  %1976 = vmatmul.msk.f32.gmra.mxu0 %vm596_vm3, %v584_v8 }
 0x240   : > { %2009 = vmatmul.msk.f32.gmra.mxu1 %vm596_vm3, %v584_v8 }
 0x244   : > { %v2838_v9 = vpop.f32.mrf.mxu0  ;;  %v2840_v10 = vpop.f32.mrf.mxu1 }
 0x245   : > { %3528 = vst [vmem:[#allocation32_spill] sm:$0xff] %v2838_v9  ;;  %v1217_v11 = vmax.f32 %v2838_v9, %v2840_v10 }
 0x246   : > { %v585_v12 = vpop.trf.xlu1 }
 0x247   : > { %1218 = vmax.xlane.f32.xlu2 %v1217_v11  ;;  %1977 = vmatmul.msk.f32.gmra.mxu0 %vm596_vm3, %v585_v12 }
 0x248   : > { %2010 = vmatmul.msk.f32.gmra.mxu1 %vm596_vm3, %v585_v12 }
 0x24c   : > { %v2846_v13 = vpop.f32.mrf.mxu0  ;;  %v2848_v16 = vpop.f32.mrf.mxu1 }
 0x24d   : > { %3529 = vst [vmem:[#allocation33_spill] sm:$0xff] %v2846_v13  ;;  %v1220_v17 = vmax.f32 %v2846_v13, %v2848_v16 }
 0x24e   : > { %v586_v18 = vpop.trf.xlu1 }
 0x24f   : > { %1221 = vmax.xlane.f32.xlu2 %v1220_v17  ;;  %1978 = vmatmul.msk.f32.gmra.mxu0 %vm596_vm3, %v586_v18 }
 0x250   : > { %2011 = vmatmul.msk.f32.gmra.mxu1 %vm596_vm3, %v586_v18 }
 0x254   : > { %v2854_v19 = vpop.f32.mrf.mxu0  ;;  %v2856_v22 = vpop.f32.mrf.mxu1 }
 0x255   : > { %3530 = vst [vmem:[#allocation34_spill] sm:$0xff] %v2854_v19  ;;  %v1223_v23 = vmax.f32 %v2854_v19, %v2856_v22 }
 0x256   : > { %v587_v24 = vpop.trf.xlu1 }
 0x257   : > { %1224 = vmax.xlane.f32.xlu2 %v1223_v23  ;;  %1979 = vmatmul.msk.f32.gmra.mxu0 %vm596_vm3, %v587_v24 }
 0x258   : > { %2012 = vmatmul.msk.f32.gmra.mxu1 %vm596_vm3, %v587_v24 }
 0x25c   : > { %v2862_v25 = vpop.f32.mrf.mxu0  ;;  %v2864_v26 = vpop.f32.mrf.mxu1 }
 0x25d   : > { %3531 = vst [vmem:[#allocation35_spill] sm:$0xff] %v2862_v25  ;;  %v1226_v27 = vmax.f32 %v2862_v25, %v2864_v26 }
 0x25e   : > { %v588_v28 = vpop.trf.xlu1 }
 0x25f   : > { %1227 = vmax.xlane.f32.xlu2 %v1226_v27  ;;  %1980 = vmatmul.msk.f32.gmra.mxu0 %vm596_vm3, %v588_v28 }
 0x260   : > { %2013 = vmatmul.msk.f32.gmra.mxu1 %vm596_vm3, %v588_v28 }
 0x264   : > { %v2870_v29 = vpop.f32.mrf.mxu0  ;;  %v2872_v30 = vpop.f32.mrf.mxu1 }
 0x265   : > { %3532 = vst [vmem:[#allocation36_spill] sm:$0xff] %v2870_v29  ;;  %v1229_v31 = vmax.f32 %v2870_v29, %v2872_v30 }
 0x266   : > { %v589_v32 = vpop.trf.xlu1 }
 0x267   : > { %1230 = vmax.xlane.f32.xlu0 %v1229_v31  ;;  %1981 = vmatmul.msk.f32.gmra.mxu0 %vm596_vm3, %v589_v32 }
 0x268   : > { %2014 = vmatmul.msk.f32.gmra.mxu1 %vm596_vm3, %v589_v32 }
 0x26c   : > { %v2878_v33 = vpop.f32.mrf.mxu0  ;;  %v2880_v34 = vpop.f32.mrf.mxu1 }
 0x26d   : > { %3533 = vst [vmem:[#allocation37_spill] sm:$0xff] %v2878_v33  ;;  %v1232_v35 = vmax.f32 %v2878_v33, %v2880_v34 }
 0x26e   : > { %v590_v36 = vpop.trf.xlu1 }
 0x26f   : > { %1233 = vmax.xlane.f32.xlu2 %v1232_v35  ;;  %1982 = vmatmul.msk.f32.gmra.mxu0 %vm596_vm3, %v590_v36 }
 0x270   : > { %2015 = vmatmul.msk.f32.gmra.mxu1 %vm596_vm3, %v590_v36 }
 0x274   : > { %v2886_v37 = vpop.f32.mrf.mxu0  ;;  %v2888_v38 = vpop.f32.mrf.mxu1 }
 0x275   : > { %3534 = vst [vmem:[#allocation38_spill] sm:$0xff] %v2886_v37  ;;  %v1235_v39 = vmax.f32 %v2886_v37, %v2888_v38 }
 0x276   : > { %v591_v40 = vpop.trf.xlu1 }
 0x277   : > { %1236 = vmax.xlane.f32.xlu2 %v1235_v39  ;;  %1983 = vmatmul.msk.f32.gmra.mxu0 %vm596_vm3, %v591_v40 }
 0x278   : > { %2016 = vmatmul.msk.f32.gmra.mxu1 %vm596_vm3, %v591_v40 }
 0x27c   : > { %v2894_v43 = vpop.f32.mrf.mxu0  ;;  %v2896_v46 = vpop.f32.mrf.mxu1 }
 0x27d   : > { %3535 = vst [vmem:[#allocation39_spill] sm:$0xff] %v2894_v43 }
 0x284   : > { %v2898_v49 = vpop.f32.mrf.mxu0  ;;  %v2900_v52 = vpop.f32.mrf.mxu1 }
 0x285   : > { %3536 = vst [vmem:[#allocation40_spill] sm:$0xff] %v2898_v49 }
 0x286   : > { %3537 = vst [vmem:[#allocation41_spill] sm:$0xff] %v2900_v52 }
 0x28c   : > { %v2902_v55 = vpop.f32.mrf.mxu0  ;;  %v2904_v58 = vpop.f32.mrf.mxu1 }
 0x28d   : > { %3538 = vst [vmem:[#allocation42_spill] sm:$0xff] %v2902_v55 }
 0x28e   : > { %3539 = vst [vmem:[#allocation43_spill] sm:$0xff] %v2904_v58 }
 0x294   : > { %v2906_v61 = vpop.f32.mrf.mxu0  ;;  %v2908_v62 = vpop.f32.mrf.mxu1 }
 0x295   : > { %3540 = vst [vmem:[#allocation44_spill] sm:$0xff] %v2906_v61 }
 0x296   : > { %3541 = vst [vmem:[#allocation45_spill] sm:$0xff] %v2908_v62 }
 0x29c   : > { %v2910_v2 = vpop.f32.mrf.mxu0  ;;  %v2912_v4 = vpop.f32.mrf.mxu1 }
 0x29d   : > { %3542 = vst [vmem:[#allocation46_spill] sm:$0xff] %v2910_v2 }
 0x29e   : > { %3543 = vst [vmem:[#allocation47_spill] sm:$0xff] %v2912_v4 }
 0x2a4   : > { %v2914_v7 = vpop.f32.mrf.mxu0  ;;  %v2916_v8 = vpop.f32.mrf.mxu1 }
 0x2a5   : > { %3544 = vst [vmem:[#allocation48_spill] sm:$0xff] %v2914_v7 }
 0x2a6   : > { %3545 = vst [vmem:[#allocation49_spill] sm:$0xff] %v2916_v8 }
 0x2ac   : > { %v2918_v11 = vpop.f32.mrf.mxu0  ;;  %v2920_v12 = vpop.f32.mrf.mxu1 }
 0x2ad   : > { %3546 = vst [vmem:[#allocation50_spill] sm:$0xff] %v2918_v11 }
 0x2ae   : > { %3547 = vst [vmem:[#allocation51_spill] sm:$0xff] %v2920_v12 }
 0x2b4   : > { %v2922_v17 = vpop.f32.mrf.mxu0 }
 0x2b5   : > { %3548 = vst [vmem:[#allocation52_spill] sm:$0xff] %v2922_v17  ;;  %v2924_v18 = vpop.f32.mrf.mxu1 }
 0x2b6   : > { %3549 = vst [vmem:[#allocation53_spill] sm:$0xff] %v2924_v18 }
 0x2bc   : > { %v2926_v23 = vpop.f32.mrf.mxu0 }
 0x2bd   : > { %3550 = vst [vmem:[#allocation54_spill] sm:$0xff] %v2926_v23  ;;  %v2928_v24 = vpop.f32.mrf.mxu1 }
 0x2be   : > { %3551 = vst [vmem:[#allocation55_spill] sm:$0xff] %v2928_v24 }
 0x2c4   : > { %v2930_v27 = vpop.f32.mrf.mxu0 }
 0x2c5   : > { %3552 = vst [vmem:[#allocation56_spill] sm:$0xff] %v2930_v27  ;;  %v2932_v28 = vpop.f32.mrf.mxu1 }
 0x2c6   : > { %v1265_v31 = vmax.f32 %v2930_v27, %v2932_v28 }
 0x2c8   : > { %1266 = vmax.xlane.f32.xlu0 %v1265_v31  ;;  %v925_v31 = vmax.f32 %v2784_v44, %v2796_v50 }
 0x2ca   : > { %v927_v20 = vmax.f32 %v925_v31, %v2808_v56 }
 0x2cc   : > { %v2936_v32 = vpop.f32.mrf.mxu0  ;;  %v929_v14 = vmax.f32 %v927_v20, %v2822_v63 }
 0x2cd   : > { %3553 = vst [vmem:[#allocation57_spill] sm:$0xff] %v2936_v32  ;;  %v2938_v35 = vpop.f32.mrf.mxu1 }
 0x2ce   : > { %3554 = vst [vmem:[#allocation58_spill] sm:$0xff] %v2938_v35  ;;  %v1268_v36 = vmax.f32 %v2936_v32, %v2938_v35  ;;  %v931_v47 = vmax.f32 %v929_v14, %v2838_v9  ;;  %v1262_v14 = vmax.f32 %v2926_v23, %v2928_v24 }
 0x2d0   : > { %1269 = vmax.xlane.f32.xlu0 %v1268_v36  ;;  %v928_v36 = vmax.f32 %v926_v21, %v2814_v59  ;;  %v933_v31 = vmax.f32 %v931_v47, %v2854_v19 }
 0x2d2   : > { %v930_v41 = vmax.f32 %v928_v36, %v2830_v5  ;;  %v935_v21 = vmax.f32 %v933_v31, %v2870_v29 }
 0x2d4   : > { %v2942_v39 = vpop.f32.mrf.mxu0  ;;  %v932_v1 = vmax.f32 %v930_v41, %v2846_v13  ;;  %v937_v63 = vmax.f32 %v935_v21, %v2886_v37 }
 0x2d5   : > { %3555 = vst [vmem:[#allocation59_spill] sm:$0xff] %v2942_v39  ;;  %v2944_v40 = vpop.f32.mrf.mxu1 }
 0x2d6   : > { %v1271_v3 = vmax.f32 %v2942_v39, %v2944_v40  ;;  %v934_v44 = vmax.f32 %v932_v1, %v2862_v25  ;;  %v939_v36 = vmax.f32 %v937_v63, %v2898_v49  ;;  %v1259_v63 = vmax.f32 %v2922_v17, %v2924_v18 }
 0x2d8   : > { %1272 = vmax.xlane.f32.xlu0 %v1271_v3  ;;  %v936_v20 = vmax.f32 %v934_v44, %v2878_v33  ;;  %v941_v44 = vmax.f32 %v939_v36, %v2906_v61 }
 0x2da   : > { %v938_v47 = vmax.f32 %v936_v20, %v2894_v43  ;;  %v943_v31 = vmax.f32 %v941_v44, %v2914_v7 }
 0x2dc   : > { %v2954_v15 = vpop.f32.mrf.mxu0  ;;  %v945_v9 = vmax.f32 %v943_v31, %v2922_v17 }
 0x2dd   : > { %3556 = vst [vmem:[#allocation60_spill] sm:$0xff] %v2954_v15  ;;  %v2958_v35 = vpop.f32.mrf.mxu1 }
 0x2de   : > { %3557 = vst [vmem:[#allocation61_spill] sm:$0xff] %v2958_v35  ;;  %v1274_v3 = vmax.f32 %v2954_v15, %v2958_v35 }
 0x2e0   : > { %1275 = vmax.xlane.f32.xlu0 %v1274_v3  ;;  %v940_v3 = vmax.f32 %v938_v47, %v2902_v55 }
 0x2e2   : > { %v942_v1 = vmax.f32 %v940_v3, %v2910_v2 }
 0x2e4   : > { %v2968_v50 = vpop.f32.mrf.mxu0  ;;  %v944_v5 = vmax.f32 %v942_v1, %v2918_v11 }
 0x2e5   : > { %3558 = vst [vmem:[#allocation62_spill] sm:$0xff] %v2968_v50  ;;  %v2972_v35 = vpop.f32.mrf.mxu1 }
 0x2e6   : > { %v1277_v41 = vmax.f32 %v2968_v50, %v2972_v35 }
 0x2e8   : > { %1263 = vmax.xlane.f32.xlu0 %v1262_v14  ;;  %1278 = vmax.xlane.f32.xlu2 %v1277_v41  ;;  %v946_v14 = vmax.f32 %v944_v5, %v2926_v23  ;;  %v947_v41 = vmax.f32 %v945_v9, %v2930_v27  ;;  %v1256_v5 = vmax.f32 %v2918_v11, %v2920_v12 }
 0x2ea   : > { %v948_v47 = vmax.f32 %v946_v14, %v2936_v32  ;;  %v949_v36 = vmax.f32 %v947_v41, %v2942_v39  ;;  %v1253_v41 = vmax.f32 %v2914_v7, %v2916_v8 }
 0x2ec   : > { %v2984_v21 = vpop.f32.mrf.mxu0  ;;  %v950_v3 = vmax.f32 %v948_v47, %v2954_v15  ;;  %v951_v44 = vmax.f32 %v949_v36, %v2968_v50 }
 0x2ed   : > { %3559 = vst [vmem:[#allocation63_spill] sm:$0xff] %v2984_v21  ;;  %v2988_v13 = vpop.f32.mrf.mxu1 }
 0x2ee   : > { %v1280_v20 = vmax.f32 %v2984_v21, %v2988_v13  ;;  %v952_v31 = vmax.f32 %v950_v3, %v2984_v21 }
 0x2f0   : > { %1260 = vmax.xlane.f32.xlu0 %v1259_v63  ;;  %1281 = vmax.xlane.f32.xlu2 %v1280_v20 }
 0x2f4   : > { %v3000_v1 = vpop.f32.mrf.mxu0 }
 0x2f5   : > { %3560 = vst [vmem:[#allocation64_spill] sm:$0xff] %v3000_v1  ;;  %v953_v43 = vmax.f32 %v951_v44, %v3000_v1  ;;  %v3008_v17 = vpop.f32.mrf.mxu1  ;;  %v962_v44 = vmax.f32 %v2786_v45, %v2798_v51 }
 0x2f6   : > { %v1283_v3 = vmax.f32 %v3000_v1, %v3008_v17 }
 0x2f7   : > { %v954_v9 = vmax.f32 %v952_v31, %v953_v43  ;;  %v961_v43 = vmax.f32 %v2780_v42, %v2792_v48  ;;  %v964_v31 = vmax.f32 %v962_v44, %v2810_v57 }
 0x2f8   : > { %1257 = vmax.xlane.f32.xlu0 %v1256_v5  ;;  %1284 = vmax.xlane.f32.xlu2 %v1283_v3 }
 0x2f9   : > { %v955_v63 = vrot.slane %v954_v9, 4 }
 0x2fb   : > { %v956_v20 = vmax.f32 %v954_v9, %v955_v63  ;;  %v1250_v9 = vmax.f32 %v2910_v2, %v2912_v4  ;;  %v963_v63 = vmax.f32 %v961_v43, %v2804_v54 }
 0x2fd   : > { %v957_v14 = vrot.slane %v956_v20, 2 }
 0x2ff   : > { %v958_v47 = vmax.f32 %v956_v20, %v957_v14  ;;  %v966_v20 = vmax.f32 %v964_v31, %v2824_v0  ;;  %v1247_v31 = vmax.f32 %v2906_v61, %v2908_v62 }
 0x300   : > { %1254 = vmax.xlane.f32.xlu0 %v1253_v41  ;;  %v965_v41 = vmax.f32 %v963_v63, %v2816_v60 }
 0x301   : > { %v959_v36 = vrot.slane %v958_v47, 1 }
 0x302   : > { %v967_v3 = vmax.f32 %v965_v41, %v2832_v6  ;;  %v1205_v41 = vmax.f32 %v2808_v56, %v2810_v57 }
 0x303   : > { %v3014_v11 = vmax.f32 %v958_v47, %v959_v36  ;;  %v968_v47 = vmax.f32 %v966_v20, %v2840_v10  ;;  %v1208_v36 = vmax.f32 %v2814_v59, %v2816_v60 }
 0x305   : > { %v1060_v5 = vsub.f32 %v3000_v1, %v3014_v11  ;;  %v970_v44 = vmax.f32 %v968_v47, %v2856_v22  ;;  %1209 = vmax.xlane.f32.xlu2 %v1208_v36  ;;  %v969_v1 = vmax.f32 %v967_v3, %v2848_v16 }
 0x307   : > { %v1186_v14 = vmul.f32 1.442695, %v1060_v5  ;;  %v972_v43 = vmax.f32 %v970_v44, %v2872_v30  ;;  %v1241_v44 = vmax.f32 %v2898_v49, %v2900_v52 }
 0x308   : > { %1251 = vmax.xlane.f32.xlu0 %v1250_v9  ;;  %v971_v9 = vmax.f32 %v969_v1, %v2864_v26 }
 0x309   : > { %2096 = vpow2.f32 %v1186_v14  ;;  %v974_v63 = vmax.f32 %v972_v43, %v2888_v38 }
 0x30a   : > { %v973_v20 = vmax.f32 %v971_v9, %v2880_v34 }
 0x30b   : > { %v976_v14 = vmax.f32 %v974_v63, %v2900_v52 }
 0x30c   : > { %v975_v47 = vmax.f32 %v973_v20, %v2896_v46  ;;  %v1202_v20 = vmax.f32 %v2802_v53, %v2804_v54 }
 0x30d   : > { %v978_v36 = vmax.f32 %v976_v14, %v2908_v62  ;;  %1206 = vmax.xlane.f32.xlu2 %v1205_v41  ;;  %v1022_v62 = vsub.f32 %v2862_v25, %v3014_v11 }
 0x30e   : > { %v977_v3 = vmax.f32 %v975_v47, %v2904_v58  ;;  %v3562_v47 = vld [vmem:[#allocation58_spill] sm:$0xff] }
 0x30f   : > { %v2097_v5 = vpop.eup %2096  ;;  %v980_v1 = vmax.f32 %v978_v36, %v2916_v8 }
 0x310   : > { %1248 = vmax.xlane.f32.xlu0 %v1247_v31  ;;  %1498 = vmatpush.msra.mxu3 %v2097_v5  ;;  %v979_v43 = vmax.f32 %v977_v3, %v2912_v4  ;;  %v3048_v31 = vpop.xlane.xlu2 %1212 }
 0x311   : > { %3561 = vst [vmem:[#allocation65_spill] sm:$0xff] %v3048_v31  ;;  %v982_v5 = vmax.f32 %v980_v1, %v2924_v18  ;;  %v3563_v31 = vld [vmem:[#allocation61_spill] sm:$0xff]  ;;  %v1028_v1 = vsub.f32 %v2886_v37, %v3014_v11  ;;  %v1110_v37 = vmul.f32 1.442695, %v1022_v62  ;;  %v1058_v62 = vsub.f32 %v2984_v21, %v3014_v11 }
 0x312   : > { %v981_v9 = vmax.f32 %v979_v43, %v2920_v12  ;;  %v1052_v21 = vsub.f32 %v2942_v39, %v3014_v11 }
 0x313   : > { %v984_v63 = vmax.f32 %v982_v5, %v2932_v28 }
 0x314   : > { %v983_v14 = vmax.f32 %v981_v9, %v2928_v24  ;;  %v1026_v9 = vsub.f32 %v2878_v33, %v3014_v11  ;;  %v3566_v33 = vld [vmem:[#allocation33_spill] sm:$0xff] }
 0x315   : > { %v986_v41 = vmax.f32 %v984_v63, %v2944_v40  ;;  %1203 = vmax.xlane.f32.xlu2 %v1202_v20  ;;  %v3565_v63 = vld [vmem:[#allocation29_spill] sm:$0xff]  ;;  %v1018_v8 = vsub.f32 %v3566_v33, %v3014_v11 }
 0x316   : > { %v985_v36 = vmax.f32 %v983_v14, %v3562_v47  ;;  %v1199_v20 = vmax.f32 %v3565_v63, %v2798_v51  ;;  %v1024_v14 = vsub.f32 %v2870_v29, %v3014_v11  ;;  %v3567_v29 = vld [vmem:[#allocation28_spill] sm:$0xff] }
 0x317   : > { %v988_v3 = vmax.f32 %v986_v41, %v2972_v35  ;;  %v1102_v12 = vmul.f32 1.442695, %v1018_v8  ;;  %v1010_v8 = vsub.f32 %v2814_v59, %v3014_v11 }
 0x318   : > { %1242 = vmax.xlane.f32.xlu0 %v1241_v44  ;;  %v987_v52 = vmax.f32 %v985_v36, %v3563_v31  ;;  %v3063_v43 = vpop.xlane.xlu2 %1215  ;;  %v1122_v36 = vmul.f32 1.442695, %v1028_v1  ;;  %v1114_v4 = vmul.f32 1.442695, %v1024_v14  ;;  %v3570_v14 = vld [vmem:[#allocation31_spill] sm:$0xff] }
 0x319   : > { %v990_v44 = vmax.f32 %v988_v3, %v3008_v17  ;;  %3564 = vst [vmem:[#allocation58_spill] sm:$0xff] %v3063_v43  ;;  %v1118_v3 = vmul.f32 1.442695, %v1026_v9  ;;  %v1020_v43 = vsub.f32 %v2854_v19, %v3014_v11 }
 0x31a   : > { %v989_v5 = vmax.f32 %v987_v52, %v2988_v13  ;;  %2098 = vpow2.f32 %v1122_v36  ;;  %v1014_v36 = vsub.f32 %v3570_v14, %v3014_v11 }
 0x31b   : > { %2100 = vpow2.f32 %v1118_v3  ;;  %v1106_v25 = vmul.f32 1.442695, %v1020_v43 }
 0x31c   : > { %v991_v41 = vmax.f32 %v989_v5, %v990_v44  ;;  %v1196_v44 = vmax.f32 %v3567_v29, %v2792_v48  ;;  %v3569_v5 = vld [vmem:[#allocation32_spill] sm:$0xff]  ;;  %2102 = vpow2.f32 %v1114_v4  ;;  %v1056_v4 = vsub.f32 %v2968_v50, %v3014_v11 }
 0x31d   : > { %1200 = vmax.xlane.f32.xlu2 %v1199_v20  ;;  %v1016_v20 = vsub.f32 %v3569_v5, %v3014_v11  ;;  %2104 = vpow2.f32 %v1110_v37  ;;  %v1094_v37 = vmul.f32 1.442695, %v1014_v36 }
 0x31e   : > { %v992_v52 = vrot.slane %v991_v41, 4  ;;  %2106 = vpow2.f32 %v1106_v25  ;;  %v1008_v25 = vsub.f32 %v2808_v56, %v3014_v11  ;;  %v1178_v36 = vmul.f32 1.442695, %v1056_v4 }
 0x31f   : > { %v1098_v5 = vmul.f32 1.442695, %v1016_v20  ;;  %2108 = vpow2.f32 %v1102_v12  ;;  %v1004_v4 = vsub.f32 %v3565_v63, %v3014_v11 }
 0x320   : > { %v3080_v1 = vpop.xlane.xlu2 %1218  ;;  %v993_v9 = vmax.f32 %v991_v41, %v992_v52  ;;  %v2099_v19 = vpop.eup %2098  ;;  %v1182_v41 = vmul.f32 1.442695, %v1058_v62  ;;  %v3572_v52 = vld [vmem:[#allocation27_spill] sm:$0xff]  ;;  %v1006_v62 = vsub.f32 %v2802_v53, %v3014_v11 }
 0x321   : > { %3568 = vst [vmem:[#allocation61_spill] sm:$0xff] %v3080_v1  ;;  %1478 = vmatpush.msra.mxu2 %v2099_v19  ;;  %v2101_v3 = vpop.eup %2100  ;;  %v3571_v1 = vld [vmem:[#allocation30_spill] sm:$0xff]  ;;  %v1054_v19 = vsub.f32 %v2954_v15, %v3014_v11  ;;  %2110 = vpow2.f32 %v1098_v5 }
 0x322   : > { %v1012_v33 = vsub.f32 %v3571_v1, %v3014_v11  ;;  %v994_v42 = vrot.slane %v993_v9, 2  ;;  %v2103_v43 = vpop.eup %2102  ;;  %2112 = vpow2.f32 %v1094_v37  ;;  %v1170_v37 = vmul.f32 1.442695, %v1052_v21 }
 0x323   : > { %1479 = vmatpush.msra.mxu2 %v2101_v3  ;;  %v2105_v20 = vpop.eup %2104  ;;  %v1174_v5 = vmul.f32 1.442695, %v1054_v19  ;;  %2114 = vpow2.f32 %v1182_v41  ;;  %v1002_v19 = vsub.f32 %v3567_v29, %v3014_v11  ;;  %v1078_v41 = vmul.f32 1.442695, %v1006_v62  ;;  %v3573_v62 = vld [vmem:[#allocation52_spill] sm:$0xff] }
 0x324   : > { %v995_v50 = vmax.f32 %v993_v9, %v994_v42  ;;  %v1090_v3 = vmul.f32 1.442695, %v1012_v33  ;;  %v2107_v12 = vpop.eup %2106  ;;  %v1651_v42 = vld [vmem:[%s3420_s7] sm:$0xf]  ;;  %v1050_v33 = vsub.f32 %v2936_v32, %v3014_v11  ;;  %v1000_v21 = vsub.f32 %v3572_v52, %v3014_v11 }
 0x325   : > { %1197 = vmax.xlane.f32.xlu2 %v1196_v44  ;;  %1480 = vmatpush.msra.mxu2 %v2103_v43  ;;  %v1193_v44 = vmax.f32 %v3572_v52, %v2786_v45  ;;  %v1086_v43 = vmul.f32 1.442695, %v1010_v8  ;;  %v2109_v9 = vpop.eup %2108  ;;  %v1048_v8 = vsub.f32 %v2930_v27, %v3014_v11 }
 0x326   : > { %2116 = vpow2.f32 %v1090_v3 }
 0x327   : > { %1481 = vmatpush.msra.mxu2 %v2105_v20  ;;  %v1082_v20 = vmul.f32 1.442695, %v1008_v25  ;;  %2118 = vpow2.f32 %v1178_v36  ;;  %v2111_v39 = vpop.eup %2110  ;;  %v1244_v25 = vmax.f32 %v2902_v55, %v2904_v58  ;;  %v1162_v32 = vmul.f32 1.442695, %v1048_v8 }
 0x328   : > { %v3102_v15 = vpop.xlane.xlu2 %1221  ;;  %2120 = vpow2.f32 %v1086_v43  ;;  %v2113_v3 = vpop.eup %2112  ;;  %v1044_v43 = vsub.f32 %v3573_v62, %v3014_v11 }
 0x329   : > { %1482 = vmatpush.msra.mxu2 %v2107_v12  ;;  %v1046_v12 = vsub.f32 %v2926_v23, %v3014_v11  ;;  %2122 = vpow2.f32 %v1174_v5  ;;  %v2115_v27 = vpop.eup %2114  ;;  %v1070_v23 = vmul.f32 1.442695, %v1002_v19 }
 0x32a   : > { %2124 = vpow2.f32 %v1082_v20  ;;  %1499 = vmatpush.msra.mxu3 %v2115_v27  ;;  %v1040_v27 = vsub.f32 %v2914_v7, %v3014_v11  ;;  %v1154_v19 = vmul.f32 1.442695, %v1044_v43  ;;  %v3580_v7 = vld [vmem:[#allocation51_spill] sm:$0xff] }
 0x32b   : > { %1483 = vmatpush.msra.mxu2 %v2109_v9  ;;  %v1074_v9 = vmul.f32 1.442695, %v1004_v4  ;;  %2126 = vpow2.f32 %v1170_v37  ;;  %v1066_v37 = vmul.f32 1.442695, %v1000_v21  ;;  %v1038_v21 = vsub.f32 %v2910_v2, %v3014_v11 }
 0x32c   : > { %1654 = vperm.xlu0 %2095, %v1651_v42   ;;  %v1166_v42 = vmul.f32 1.442695, %v1050_v33  ;;  %v3574_v33 = vld [vmem:[#allocation25_spill] sm:$0xff]  ;;  %2128 = vpow2.f32 %v1078_v41 }
 0x32d   : > { %1194 = vmax.xlane.f32.xlu2 %v1193_v44  ;;  %v996_v44 = vrot.slane %v995_v50, 1  ;;  %1484 = vmatpush.msra.mxu2 %v2111_v39  ;;  %v2117_v39 = vpop.eup %2116  ;;  %v998_v5 = vsub.f32 %v3574_v33, %v3014_v11 }
 0x32e   : > { %v2119_v52 = vpop.eup %2118  ;;  %2130 = vpow2.f32 %v1166_v42 }
 0x32f   : > { %v3123_v36 = vmax.f32 %v995_v50, %v996_v44  ;;  %1485 = vmatpush.msra.mxu2 %v2113_v3  ;;  %v3575_v50 = vld [vmem:[#allocation50_spill] sm:$0xff]  ;;  %v1158_v44 = vmul.f32 1.442695, %v1046_v12  ;;  %v2121_v20 = vpop.eup %2120  ;;  %2132 = vpow2.f32 %v1074_v9  ;;  %1500 = vmatpush.msra.mxu3 %v2119_v52  ;;  %v1062_v42 = vmul.f32 1.442695, %v998_v5  ;;  %v3576_v52 = vld [vmem:[#allocation39_spill] sm:$0xff] }
 0x330   : > { %v1042_v4 = vsub.f32 %v3575_v50, %v3014_v11  ;;  %v3131_v62 = vpop.xlane.xlu2 %1224  ;;  %2134 = vpow2.f32 %v1162_v32  ;;  %v3581_v50 = vld [vmem:[#allocation38_spill] sm:$0xff] }
 0x331   : > { %1486 = vmatpush.msra.mxu2 %v2117_v39  ;;  %v1029_v8 = vsub.f32 %v2888_v38, %v3123_v36  ;;  %v1027_v12 = vsub.f32 %v2880_v34, %v3123_v36  ;;  %2136 = vpow2.f32 %v1070_v23  ;;  %v1238_v39 = vmax.f32 %v3576_v52, %v2896_v46 }
 0x332   : > { %v1150_v9 = vmul.f32 1.442695, %v1042_v4  ;;  %2138 = vpow2.f32 %v1158_v44  ;;  %v1025_v32 = vsub.f32 %v2872_v30, %v3123_v36  ;;  %v1036_v23 = vsub.f32 %v2906_v61, %v3014_v11 }
 0x333   : > { %1487 = vmatpush.msra.mxu2 %v2121_v20  ;;  %2140 = vpow2.f32 %v1066_v37  ;;  %v1124_v20 = vmul.f32 1.442695, %v1029_v8  ;;  %v1023_v44 = vsub.f32 %v2864_v26, %v3123_v36  ;;  %v1034_v8 = vsub.f32 %v2902_v55, %v3014_v11 }
 0x334   : > { %2142 = vpow2.f32 %v1154_v19  ;;  %v1142_v37 = vmul.f32 1.442695, %v1038_v21  ;;  %v1116_v19 = vmul.f32 1.442695, %v1025_v32  ;;  %v1019_v21 = vsub.f32 %v2848_v16, %v3123_v36 }
 0x335   : > { %1245 = vmax.xlane.f32.xlu2 %v1244_v25  ;;  %v2123_v25 = vpop.eup %2122  ;;  %2144 = vpow2.f32 %v1062_v42  ;;  %v1032_v42 = vsub.f32 %v2898_v49, %v3014_v11  ;;  %v1134_v32 = vmul.f32 1.442695, %v1034_v8 }
 0x336   : > { %v2125_v41 = vpop.eup %2124  ;;  %1501 = vmatpush.msra.mxu3 %v2123_v25  ;;  %v1146_v25 = vmul.f32 1.442695, %v1040_v27  ;;  %2146 = vpow2.f32 %v1150_v9  ;;  %v1021_v27 = vsub.f32 %v2856_v22, %v3123_v36  ;;  %v1112_v9 = vmul.f32 1.442695, %v1023_v44 }
 0x337   : > { %v2127_v3 = vpop.eup %2126  ;;  %1488 = vmatpush.msra.mxu2 %v2125_v41  ;;  %v1120_v41 = vmul.f32 1.442695, %v1027_v12  ;;  %2148 = vpow2.f32 %v1124_v20  ;;  %v1138_v12 = vmul.f32 1.442695, %v1036_v23  ;;  %v1017_v23 = vsub.f32 %v2840_v10, %v3123_v36 }
 0x338   : > { %v2129_v43 = vpop.eup %2128  ;;  %1502 = vmatpush.msra.mxu3 %v2127_v3  ;;  %2150 = vpow2.f32 %v1146_v25  ;;  %v1108_v25 = vmul.f32 1.442695, %v1021_v27  ;;  %v1061_v44 = vsub.f32 %v3008_v17, %v3123_v36  ;;  %v1104_v8 = vmul.f32 1.442695, %v1019_v21 }
 0x339   : > { %v2131_v5 = vpop.eup %2130  ;;  %1489 = vmatpush.msra.mxu2 %v2129_v43  ;;  %2152 = vpow2.f32 %v1120_v41  ;;  %v1130_v41 = vmul.f32 1.442695, %v1032_v42  ;;  %v1059_v27 = vsub.f32 %v2988_v13, %v3123_v36  ;;  %v1013_v42 = vsub.f32 %v2824_v0, %v3123_v36 }
 0x33a   : > { %v2133_v4 = vpop.eup %2132  ;;  %1503 = vmatpush.msra.mxu3 %v2131_v5  ;;  %v3155_v5 = vpop.xlane.xlu2 %1227  ;;  %2154 = vpow2.f32 %v1142_v37  ;;  %v3577_v37 = vld [vmem:[#allocation21_spill] sm:$0xff]  ;;  %v1188_v21 = vmul.f32 1.442695, %v1061_v44 }
 0x33b   : > { %v2135_v2 = vpop.eup %2134  ;;  %1490 = vmatpush.msra.mxu2 %v2133_v4  ;;  %2156 = vpow2.f32 %v1116_v19 }
 0x33c   : > { %v2137_v3 = vpop.eup %2136  ;;  %1504 = vmatpush.msra.mxu3 %v2135_v2  ;;  %v1030_v2 = vsub.f32 %v3576_v52, %v3014_v11  ;;  %2158 = vpow2.f32 %v1138_v12  ;;  %v1015_v11 = vsub.f32 %v2832_v6, %v3123_v36  ;;  %v1100_v12 = vmul.f32 1.442695, %v1017_v23 }
 0x33d   : > { %1239 = vmax.xlane.f32.xlu2 %v1238_v39  ;;  %v2139_v39 = vpop.eup %2138  ;;  %1491 = vmatpush.msra.mxu2 %v2137_v3  ;;  %2160 = vpow2.f32 %v1112_v9  ;;  %v1057_v9 = vsub.f32 %v2972_v35, %v3123_v36  ;;  %v1055_v23 = vsub.f32 %v3563_v31, %v3123_v36 }
 0x33e   : > { %v2141_v43 = vpop.eup %2140  ;;  %1505 = vmatpush.msra.mxu3 %v2139_v39  ;;  %v1126_v19 = vmul.f32 1.442695, %v1030_v2  ;;  %2162 = vpow2.f32 %v1134_v32  ;;  %v1011_v2 = vsub.f32 %v2816_v60, %v3123_v36  ;;  %v1096_v32 = vmul.f32 1.442695, %v1015_v11 }
 0x33f   : > { %v2143_v4 = vpop.eup %2142  ;;  %1492 = vmatpush.msra.mxu2 %v2141_v43  ;;  %2164 = vpow2.f32 %v1108_v25  ;;  %v1184_v25 = vmul.f32 1.442695, %v1059_v27  ;;  %v1053_v11 = vsub.f32 %v2944_v40, %v3123_v36 }
 0x340   : > { %v2145_v20 = vpop.eup %2144  ;;  %1506 = vmatpush.msra.mxu3 %v2143_v4  ;;  %2166 = vpow2.f32 %v1130_v41  ;;  %v1009_v41 = vsub.f32 %v2810_v57, %v3123_v36  ;;  %v1088_v27 = vmul.f32 1.442695, %v1011_v2  ;;  %v1049_v2 = vsub.f32 %v2932_v28, %v3123_v36 }
 0x341   : > { %v2147_v3 = vpop.eup %2146  ;;  %1493 = vmatpush.msra.mxu2 %v2145_v20  ;;  %2168 = vpow2.f32 %v1104_v8  ;;  %v1180_v8 = vmul.f32 1.442695, %v1057_v9 }
 0x342   : > { %v2149_v39 = vpop.eup %2148  ;;  %1507 = vmatpush.msra.mxu3 %v2147_v3  ;;  %1494 = vmatmul.f32.vlgmr.msra.gmra.mxu2 %v3577_v37  ;;  %v3174_v52 = vpop.xlane.xlu2 %1233  ;;  %2170 = vpow2.f32 %v1126_v19  ;;  %v1007_v19 = vsub.f32 %v2804_v54, %v3123_v36  ;;  %v1084_v9 = vmul.f32 1.442695, %v1009_v41  ;;  %v1047_v41 = vsub.f32 %v2928_v24, %v3123_v36 }
 0x343   : > { %v2151_v43 = vpop.eup %2150  ;;  %1518 = vmatpush.msrb.mxu2 %v2149_v39  ;;  %2172 = vpow2.f32 %v1100_v12  ;;  %v1176_v12 = vmul.f32 1.442695, %v1055_v23  ;;  %v1003_v23 = vsub.f32 %v2792_v48, %v3123_v36 }
 0x344   : > { %v2153_v4 = vpop.eup %2152  ;;  %1508 = vmatpush.msra.mxu3 %v2151_v43  ;;  %v1092_v43 = vmul.f32 1.442695, %v1013_v42  ;;  %2174 = vpow2.f32 %v1188_v21  ;;  %v1051_v42 = vsub.f32 %v3562_v47, %v3123_v36 }
 0x345   : > { %v2155_v20 = vpop.eup %2154  ;;  %1519 = vmatpush.msrb.mxu2 %v2153_v4  ;;  %2176 = vpow2.f32 %v1096_v32  ;;  %v1172_v32 = vmul.f32 1.442695, %v1053_v11  ;;  %v1072_v55 = vmul.f32 1.442695, %v1003_v23 }
 0x346   : > { %v2157_v3 = vpop.eup %2156  ;;  %1509 = vmatpush.msra.mxu3 %v2155_v20  ;;  %2178 = vpow2.f32 %v1184_v25  ;;  %v1080_v25 = vmul.f32 1.442695, %v1007_v19 }
 0x347   : > { %v2159_v39 = vpop.eup %2158  ;;  %1520 = vmatpush.msrb.mxu2 %v2157_v3  ;;  %2180 = vpow2.f32 %v1092_v43  ;;  %v1168_v43 = vmul.f32 1.442695, %v1051_v42 }
 0x348   : > { %v2161_v44 = vpop.eup %2160  ;;  %1510 = vmatpush.msra.mxu3 %v2159_v39  ;;  %v1005_v39 = vsub.f32 %v2798_v51, %v3123_v36  ;;  %2182 = vpow2.f32 %v1180_v8  ;;  %v1001_v8 = vsub.f32 %v2786_v45, %v3123_v36 }
 0x349   : > { %v2163_v4 = vpop.eup %2162  ;;  %1521 = vmatpush.msrb.mxu2 %v2161_v44  ;;  %2184 = vpow2.f32 %v1088_v27  ;;  %v1045_v27 = vsub.f32 %v2924_v18, %v3123_v36  ;;  %v3582_v18 = vld [vmem:[#allocation49_spill] sm:$0xff] }
 0x34a   : > { %v2165_v20 = vpop.eup %2164  ;;  %1511 = vmatpush.msra.mxu3 %v2163_v4  ;;  %2186 = vpow2.f32 %v1176_v12  ;;  %v3197_v11 = vpop.xlane.xlu2 %1236  ;;  %v3579_v12 = vld [vmem:[#allocation26_spill] sm:$0xff]  ;;  %v1041_v23 = vsub.f32 %v3582_v18, %v3123_v36 }
 0x34b   : > { %v2167_v3 = vpop.eup %2166  ;;  %1522 = vmatpush.msrb.mxu2 %v2165_v20  ;;  %2188 = vpow2.f32 %v1084_v9  ;;  %v1160_v9 = vmul.f32 1.442695, %v1047_v41 }
 0x34c   : > { %v2169_v21 = vpop.eup %2168  ;;  %1512 = vmatpush.msra.mxu3 %v2167_v3  ;;  %v3578_v3 = vld [vmem:[#allocation22_spill] sm:$0xff]  ;;  %2190 = vpow2.f32 %v1172_v32  ;;  %v1068_v32 = vmul.f32 1.442695, %v1001_v8 }
 0x34d   : > { %v2171_v44 = vpop.eup %2170  ;;  %1523 = vmatpush.msrb.mxu2 %v2169_v21  ;;  %v1076_v21 = vmul.f32 1.442695, %v1005_v39  ;;  %2192 = vpow2.f32 %v1080_v25  ;;  %v1043_v39 = vsub.f32 %v3580_v7, %v3123_v36  ;;  %v1156_v25 = vmul.f32 1.442695, %v1045_v27 }
 0x34e   : > { %v2173_v4 = vpop.eup %2172  ;;  %1513 = vmatpush.msra.mxu3 %v2171_v44  ;;  %v1164_v44 = vmul.f32 1.442695, %v1049_v2  ;;  %2194 = vpow2.f32 %v1168_v43  ;;  %v1316_v2 = vsub.f32 %v3581_v50, %v3197_v11  ;;  %v3583_v43 = vld [vmem:[#allocation47_spill] sm:$0xff] }
 0x34f   : > { %v2175_v20 = vpop.eup %2174  ;;  %1514 = vmatmul.f32.vlgmr.msra.gmra.mxu3 %v3578_v3  ;;  %1524 = vmatpush.msrb.mxu2 %v2173_v4  ;;  %v999_v4 = vsub.f32 %v3579_v12, %v3123_v36  ;;  %2196 = vpow2.f32 %v1076_v21  ;;  %v1152_v7 = vmul.f32 1.442695, %v1043_v39 }
 0x350   : > { %v2177_v49 = vpop.eup %2176  ;;  %1538 = vmatpush.msrb.mxu3 %v2175_v20  ;;  %2198 = vpow2.f32 %v1164_v44  ;;  %v1410_v21 = vmul.f32 1.442695, %v1316_v2  ;;  %v1035_v2 = vsub.f32 %v2904_v58, %v3123_v36 }
 0x351   : > { %v2179_v19 = vpop.eup %2178  ;;  %1525 = vmatpush.msrb.mxu2 %v2177_v49  ;;  %v1064_v24 = vmul.f32 1.442695, %v999_v4  ;;  %2200 = vpow2.f32 %v1072_v55  ;;  %v3217_v4 = vpop.xlane.xlu0 %1230  ;;  %v3585_v55 = vld [vmem:[#allocation45_spill] sm:$0xff] }
 0x352   : > { %v2181_v42 = vpop.eup %2180  ;;  %1539 = vmatpush.msrb.mxu3 %v2179_v19  ;;  %2202 = vpow2.f32 %v1160_v9 }
 0x353   : > { %v2183_v61 = vpop.eup %2182  ;;  %1526 = vmatpush.msrb.mxu2 %v2181_v42  ;;  %v1039_v42 = vsub.f32 %v3583_v43, %v3123_v36  ;;  %2204 = vpow2.f32 %v1068_v32 }
 0x354   : > { %v2185_v20 = vpop.eup %2184  ;;  %1540 = vmatpush.msrb.mxu3 %v2183_v61  ;;  %v3584_v61 = vld [vmem:[#allocation37_spill] sm:$0xff]  ;;  %2206 = vpow2.f32 %v1156_v25 }
 0x355   : > { %v2187_v49 = vpop.eup %2186  ;;  %1527 = vmatpush.msrb.mxu2 %v2185_v20  ;;  %v1314_v8 = vsub.f32 %v3584_v61, %v3174_v52  ;;  %v1037_v20 = vsub.f32 %v3585_v55, %v3123_v36  ;;  %2208 = vpow2.f32 %v1064_v24  ;;  %v1144_v32 = vmul.f32 1.442695, %v1039_v42  ;;  %v3587_v25 = vld [vmem:[#allocation41_spill] sm:$0xff] }
 0x356   : > { %v2189_v19 = vpop.eup %2188  ;;  %1541 = vmatpush.msrb.mxu3 %v2187_v49  ;;  %v1148_v49 = vmul.f32 1.442695, %v1041_v23  ;;  %2210 = vpow2.f32 %v1152_v7  ;;  %v1031_v7 = vsub.f32 %v2896_v46, %v3123_v36  ;;  %v1136_v42 = vmul.f32 1.442695, %v1035_v2 }
 0x357   : > { %v2191_v41 = vpop.eup %2190  ;;  %1528 = vmatpush.msrb.mxu2 %v2189_v19  ;;  %v1406_v43 = vmul.f32 1.442695, %v1314_v8  ;;  %2212 = vpow2.f32 %v1410_v21  ;;  %v1140_v24 = vmul.f32 1.442695, %v1037_v20  ;;  %v3588_v8 = vld [vmem:[#allocation35_spill] sm:$0xff]  ;;  %v1317_v20 = vsub.f32 %v2888_v38, %v3197_v11 }
 0x358   : > { %v2193_v50 = vpop.eup %2192  ;;  %1542 = vmatpush.msrb.mxu3 %v2191_v41  ;;  %v3586_v41 = vld [vmem:[#allocation36_spill] sm:$0xff]  ;;  %2214 = vpow2.f32 %v1148_v49  ;;  %v1310_v21 = vsub.f32 %v3588_v8, %v3155_v5  ;;  %v1315_v11 = vsub.f32 %v2880_v34, %v3174_v52 }
 0x359   : > { %v2195_v44 = vpop.eup %2194  ;;  %1529 = vmatpush.msrb.mxu2 %v2193_v50  ;;  %v1312_v61 = vsub.f32 %v3586_v41, %v3217_v4  ;;  %v1033_v50 = vsub.f32 %v3587_v25, %v3123_v36  ;;  %2216 = vpow2.f32 %v1144_v32  ;;  %v1128_v32 = vmul.f32 1.442695, %v1031_v7 }
 0x35a   : > { %v2197_v39 = vpop.eup %2196  ;;  %1543 = vmatpush.msrb.mxu3 %v2195_v44  ;;  %2218 = vpow2.f32 %v1406_v43  ;;  %v3589_v43 = vld [vmem:[#allocation34_spill] sm:$0xff]  ;;  %v1408_v8 = vmul.f32 1.442695, %v1315_v11  ;;  %v1309_v11 = vsub.f32 %v2856_v22, %v3131_v62 }
 0x35b   : > { %v3215_v27 = vpop.xlane.xlu2 %1278  ;;  %v2199_v9 = vpop.eup %2198  ;;  %1530 = vmatpush.msrb.mxu2 %v2197_v39  ;;  %v1132_v49 = vmul.f32 1.442695, %v1033_v50  ;;  %2220 = vpow2.f32 %v1140_v24  ;;  %v3590_v24 = vld [vmem:[#allocation33_spill] sm:$0xff] }
 0x35c   : > { %v2201_v19 = vpop.eup %2200  ;;  %1544 = vmatpush.msrb.mxu3 %v2199_v9  ;;  %v1402_v9 = vmul.f32 1.442695, %v1312_v61  ;;  %2222 = vpow2.f32 %v1136_v42  ;;  %v1398_v61 = vmul.f32 1.442695, %v1310_v21  ;;  %v3591_v21 = vld [vmem:[#allocation61_spill] sm:$0xff] }
 0x35d   : > { %v2203_v23 = vpop.eup %2202  ;;  %1531 = vmatpush.msrb.mxu2 %v2201_v19 }
 0x35e   : > { %v2205_v44 = vpop.eup %2204  ;;  %1545 = vmatpush.msrb.mxu3 %v2203_v23  ;;  %2224 = vpow2.f32 %v1402_v9  ;;  %v1412_v23 = vmul.f32 1.442695, %v1317_v20  ;;  %v3592_v9 = vld [vmem:[#allocation32_spill] sm:$0xff] }
 0x35f   : > { %v2207_v58 = vpop.eup %2206  ;;  %1532 = vmatpush.msrb.mxu2 %v2205_v44  ;;  %2226 = vpow2.f32 %v1132_v49  ;;  %v1306_v44 = vsub.f32 %v3590_v24, %v3102_v15 }
 0x360   : > { %v2209_v39 = vpop.eup %2208  ;;  %1546 = vmatpush.msrb.mxu3 %v2207_v58  ;;  %v1308_v58 = vsub.f32 %v3589_v43, %v3131_v62  ;;  %2228 = vpow2.f32 %v1128_v32  ;;  %v3250_v43 = vpop.xlane.xlu0 %1266 }
 0x361   : > { %v2211_v41 = vpop.eup %2210  ;;  %1533 = vmatpush.msrb.mxu2 %v2209_v39  ;;  %2230 = vpow2.f32 %v1398_v61  ;;  %v1313_v39 = vsub.f32 %v2872_v30, %v3217_v4  ;;  %v1390_v20 = vmul.f32 1.442695, %v1306_v44  ;;  %v1396_v44 = vmul.f32 1.442695, %v1309_v11 }
 0x362   : > { %v2213_v19 = vpop.eup %2212  ;;  %1547 = vmatpush.msrb.mxu3 %v2211_v41  ;;  %1534 = vmatmul.f32.vlgmr.msrb.gmra.mxu2 %v3577_v37  ;;  %v1394_v7 = vmul.f32 1.442695, %v1308_v58  ;;  %2232 = vpow2.f32 %v1412_v23  ;;  %v1304_v41 = vsub.f32 %v3592_v9, %v3591_v21  ;;  %v3593_v58 = vld [vmem:[#allocation58_spill] sm:$0xff] }
 0x363   : > { %v3234_v36 = vpop.xlane.xlu2 %1281  ;;  %v2215_v2 = vpop.eup %2214  ;;  %1558 = vmatpush.xpose.msra.mxu2 %v2213_v19  ;;  %v1404_v32 = vmul.f32 1.442695, %v1313_v39  ;;  %v1302_v61 = vsub.f32 %v3570_v14, %v3593_v58  ;;  %v1307_v14 = vsub.f32 %v2848_v16, %v3102_v15 }
 0x364   : > { %1548 = vmatpush.msrb.mxu3 %v2215_v2  ;;  %v2217_v38 = vpop.eup %2216  ;;  %2234 = vpow2.f32 %v1394_v7  ;;  %v1311_v2 = vsub.f32 %v2864_v26, %v3155_v5 }
 0x365   : > { %v2219_v50 = vpop.eup %2218  ;;  %2236 = vpow2.f32 %v1408_v8  ;;  %v1382_v24 = vmul.f32 1.442695, %v1302_v61  ;;  %v1392_v39 = vmul.f32 1.442695, %v1307_v14 }
 0x366   : > { %1549 = vmatpush.msrb.mxu3 %v2217_v38  ;;  %v2221_v37 = vpop.eup %2220  ;;  %v1386_v38 = vmul.f32 1.442695, %v1304_v41  ;;  %2238 = vpow2.f32 %v1390_v20  ;;  %v1400_v26 = vmul.f32 1.442695, %v1311_v2 }
 0x367   : > { %1559 = vmatpush.xpose.msra.mxu2 %v2219_v50  ;;  %v2223_v42 = vpop.eup %2222  ;;  %2240 = vpow2.f32 %v1404_v32  ;;  %v3594_v50 = vld [vmem:[#allocation65_spill] sm:$0xff] }
 0x368   : > { %1550 = vmatpush.msrb.mxu3 %v2221_v37  ;;  %v2225_v34 = vpop.eup %2224  ;;  %v1300_v37 = vsub.f32 %v3571_v1, %v3594_v50  ;;  %2242 = vpow2.f32 %v1386_v38  ;;  %v1305_v1 = vsub.f32 %v2840_v10, %v3591_v21  ;;  %v3264_v8 = vpop.xlane.xlu0 %1269 }
 0x369   : > { %v2227_v52 = vpop.eup %2226  ;;  %2244 = vpow2.f32 %v1400_v26 }
 0x36a   : > { %1551 = vmatpush.msrb.mxu3 %v2223_v42  ;;  %v2229_v19 = vpop.eup %2228  ;;  %v1378_v42 = vmul.f32 1.442695, %v1300_v37  ;;  %2246 = vpow2.f32 %v1382_v24  ;;  %v1388_v9 = vmul.f32 1.442695, %v1305_v1 }
 0x36b   : > { %1560 = vmatpush.xpose.msra.mxu2 %v2225_v34  ;;  %v3246_v49 = vpop.xlane.xlu2 %1284  ;;  %v2231_v30 = vpop.eup %2230  ;;  %2248 = vpow2.f32 %v1396_v44 }
 0x36c   : > { %1552 = vmatpush.msrb.mxu3 %v2227_v52  ;;  %v2233_v4 = vpop.eup %2232  ;;  %2250 = vpow2.f32 %v1378_v42 }
 0x36d   : > { %v2235_v5 = vpop.eup %2234  ;;  %2252 = vpow2.f32 %v1392_v39 }
 0x36e   : > { %1553 = vmatpush.msrb.mxu3 %v2229_v19  ;;  %v2237_v23 = vpop.eup %2236  ;;  %v1301_v19 = vsub.f32 %v2824_v0, %v3594_v50 }
 0x36f   : > { %1554 = vmatmul.f32.vlgmr.msrb.gmra.mxu3 %v3578_v3  ;;  %1561 = vmatpush.xpose.msra.mxu2 %v2231_v30  ;;  %v2239_v7 = vpop.eup %2238 }
 0x370   : > { %1578 = vmatpush.xpose.msra.mxu3 %v2233_v4  ;;  %v2241_v62 = vpop.eup %2240  ;;  %v3271_v4 = vpop.xlane.xlu0 %1272 }
 0x371   : > { %v2243_v34 = vpop.eup %2242 }
 0x372   : > { %v2245_v15 = vpop.eup %2244 }
 0x373   : > { %1562 = vmatpush.xpose.msra.mxu2 %v2235_v5  ;;  %v2247_v20 = vpop.eup %2246 }
 0x374   : > { %1579 = vmatpush.xpose.msra.mxu3 %v2237_v23  ;;  %v2249_v10 = vpop.eup %2248 }
 0x375   : > { %v2251_v32 = vpop.eup %2250 }
 0x376   : > { %v2253_v30 = vpop.eup %2252 }
 0x377   : > { %1563 = vmatpush.xpose.msra.mxu2 %v2239_v7 }
 0x378   : > { %v1210_v3 = vpop.xlane.xlu2 %1209  ;;  %1580 = vmatpush.xpose.msra.mxu3 %v2241_v62 }
 0x379   : > { %v1298_v22 = vsub.f32 %v2814_v59, %v1210_v3  ;;  %v1303_v59 = vsub.f32 %v2832_v6, %v3593_v58  ;;  %v1299_v6 = vsub.f32 %v2816_v60, %v1210_v3  ;;  %v1380_v58 = vmul.f32 1.442695, %v1301_v19  ;;  %v3277_v3 = vpop.xlane.xlu0 %1275  ;;  %v3596_v19 = vld [vmem:[#allocation64_spill] sm:$0xff] }
 0x37b   : > { %v1374_v52 = vmul.f32 1.442695, %v1298_v22  ;;  %1564 = vmatpush.xpose.msra.mxu2 %v2243_v34  ;;  %v1384_v2 = vmul.f32 1.442695, %v1303_v59  ;;  %v1376_v0 = vmul.f32 1.442695, %v1299_v6  ;;  %v1192_v59 = vpop.xlane.xlu1 %1191 }
 0x37c   : > { %1581 = vmatpush.xpose.msra.mxu3 %v2245_v15 }
 0x37d   : > { %2254 = vpow2.f32 %v1374_v52 }
 0x37e   : > { %2256 = vpow2.f32 %v1388_v9  ;;  %v1286_v9 = vsub.f32 %v3574_v33, %v1192_v59 }
 0x37f   : > { %1565 = vmatpush.xpose.msra.mxu2 %v2247_v20 }
 0x380   : > { %v1207_v16 = vpop.xlane.xlu2 %1206  ;;  %1582 = vmatpush.xpose.msra.mxu3 %v2249_v10 }
 0x381   : > { %v1296_v41 = vsub.f32 %v2808_v56, %v1207_v16  ;;  %v1297_v26 = vsub.f32 %v2810_v57, %v1207_v16  ;;  %v3283_v52 = vpop.xlane.xlu0 %1263 }
 0x383   : > { %v1370_v21 = vmul.f32 1.442695, %v1296_v41  ;;  %1566 = vmatpush.xpose.msra.mxu2 %v2251_v32  ;;  %v2255_v56 = vpop.eup %2254  ;;  %v1372_v60 = vmul.f32 1.442695, %v1297_v26 }
 0x384   : > { %1583 = vmatpush.xpose.msra.mxu3 %v2253_v30  ;;  %v2257_v11 = vpop.eup %2256  ;;  %v1349_v30 = vsub.f32 %v3008_v17, %v3246_v49  ;;  %v3598_v17 = vld [vmem:[#allocation62_spill] sm:$0xff] }
 0x385   : > { %2258 = vpow2.f32 %v1370_v21 }
 0x386   : > { %2260 = vpow2.f32 %v1384_v2  ;;  %v1348_v2 = vsub.f32 %v3596_v19, %v3246_v49  ;;  %v1476_v26 = vmul.f32 1.442695, %v1349_v30  ;;  %v1344_v49 = vsub.f32 %v3598_v17, %v3215_v27  ;;  %v3606_v30 = vld [vmem:[#allocation55_spill] sm:$0xff]  ;;  %v3609_v17 = vld [vmem:[#allocation50_spill] sm:$0xff] }
 0x387   : > { %1567 = vmatpush.xpose.msra.mxu2 %v2255_v56  ;;  %2262 = vpow2.f32 %v1380_v58  ;;  %v1350_v58 = vmul.f32 1.442695, %v1286_v9 }
 0x388   : > { %v1204_v61 = vpop.xlane.xlu2 %1203  ;;  %1584 = vmatpush.xpose.msra.mxu3 %v2257_v11  ;;  %v1474_v11 = vmul.f32 1.442695, %v1348_v2 }
 0x389   : > { %v1294_v38 = vsub.f32 %v2802_v53, %v1204_v61  ;;  %v1295_v37 = vsub.f32 %v2804_v54, %v1204_v61 }
 0x38b   : > { %v1366_v5 = vmul.f32 1.442695, %v1294_v38  ;;  %v2259_v23 = vpop.eup %2258  ;;  %v1368_v44 = vmul.f32 1.442695, %v1295_v37  ;;  %v3293_v38 = vpop.xlane.xlu0 %1260 }
 0x38c   : > { %v2261_v50 = vpop.eup %2260  ;;  %1568 = vmatpush.xpose.msra.mxu2 %v2259_v23 }
 0x38d   : > { %2264 = vpow2.f32 %v1366_v5  ;;  %1585 = vmatpush.xpose.msra.mxu3 %v2261_v50  ;;  %v2263_v14 = vpop.eup %2262  ;;  %v1345_v50 = vsub.f32 %v2972_v35, %v3215_v27 }
 0x38e   : > { %2266 = vpow2.f32 %v1376_v0  ;;  %v1347_v0 = vsub.f32 %v2988_v13, %v3234_v36  ;;  %v3599_v13 = vld [vmem:[#allocation60_spill] sm:$0xff] }
 0x38f   : > { %2268 = vpow2.f32 %v1372_v60 }
 0x390   : > { %v1201_v24 = vpop.xlane.xlu2 %1200  ;;  %v1472_v60 = vmul.f32 1.442695, %v1347_v0 }
 0x391   : > { %v1292_v53 = vsub.f32 %v3565_v63, %v1201_v24  ;;  %v1293_v7 = vsub.f32 %v2798_v51, %v1201_v24  ;;  %1586 = vmatpush.xpose.msra.mxu3 %v2263_v14 }
 0x393   : > { %v2265_v57 = vpop.eup %2264  ;;  %v1362_v22 = vmul.f32 1.442695, %v1292_v53  ;;  %v1364_v54 = vmul.f32 1.442695, %v1293_v7  ;;  %v1466_v53 = vmul.f32 1.442695, %v1344_v49  ;;  %v3307_v7 = vpop.xlane.xlu0 %1257 }
 0x394   : > { %1569 = vmatpush.xpose.msra.mxu2 %v2265_v57  ;;  %v2267_v62 = vpop.eup %2266  ;;  %v1343_v57 = vsub.f32 %v3563_v31, %v3277_v3  ;;  %v3601_v31 = vld [vmem:[#allocation23_spill] sm:$0xff]  ;;  %v1330_v49 = vsub.f32 %v3609_v17, %v3307_v7 }
 0x395   : > { %2270 = vpow2.f32 %v1362_v22  ;;  %1587 = vmatpush.xpose.msra.mxu3 %v2267_v62  ;;  %v2269_v1 = vpop.eup %2268  ;;  %v3600_v22 = vld [vmem:[#allocation59_spill] sm:$0xff] }
 0x396   : > { %2272 = vpow2.f32 %v1368_v44  ;;  %v1468_v44 = vmul.f32 1.442695, %v1345_v50  ;;  %v1340_v62 = vsub.f32 %v3600_v22, %v3271_v4 }
 0x397   : > { %2274 = vpow2.f32 %v1364_v54 }
 0x398   : > { %v1198_v42 = vpop.xlane.xlu2 %1197 }
 0x399   : > { %v1290_v39 = vsub.f32 %v3567_v29, %v1198_v42  ;;  %v1291_v63 = vsub.f32 %v2792_v48, %v1198_v42  ;;  %1588 = vmatpush.xpose.msra.mxu3 %v2269_v1  ;;  %v1287_v29 = vsub.f32 %v3579_v12, %v1192_v59  ;;  %v3595_v48 = vld [vmem:[#allocation27_spill] sm:$0xff]  ;;  %v1341_v42 = vsub.f32 %v2944_v40, %v3271_v4 }
 0x39a   : > { %v3597_v12 = vld [vmem:[#allocation63_spill] sm:$0xff]  ;;  %v1464_v1 = vmul.f32 1.442695, %v1343_v57 }
 0x39b   : > { %v2271_v34 = vpop.eup %2270  ;;  %v1358_v15 = vmul.f32 1.442695, %v1290_v39  ;;  %v1360_v51 = vmul.f32 1.442695, %v1291_v63  ;;  %v1352_v61 = vmul.f32 1.442695, %v1287_v29  ;;  %v1255_v9 = vpop.xlane.xlu0 %1254 }
 0x39c   : > { %1570 = vmatpush.xpose.msra.mxu2 %v2271_v34  ;;  %v2273_v16 = vpop.eup %2272  ;;  %v3602_v39 = vld [vmem:[#allocation24_spill] sm:$0xff]  ;;  %v3603_v34 = vld [vmem:[#allocation57_spill] sm:$0xff]  ;;  %v1460_v59 = vmul.f32 1.442695, %v1341_v42 }
 0x39d   : > { %2276 = vpow2.f32 %v1358_v15  ;;  %1589 = vmatpush.xpose.msra.mxu3 %v2273_v16  ;;  %v2275_v20 = vpop.eup %2274  ;;  %v1338_v15 = vsub.f32 %v3603_v34, %v3264_v8  ;;  %v1339_v16 = vsub.f32 %v3562_v47, %v3264_v8  ;;  %v3605_v8 = vld [vmem:[#allocation54_spill] sm:$0xff] }
 0x39e   : > { %2278 = vpow2.f32 %v1360_v51  ;;  %v1458_v51 = vmul.f32 1.442695, %v1340_v62  ;;  %v1334_v2 = vsub.f32 %v3605_v8, %v3283_v52  ;;  %v3613_v62 = vld [vmem:[#allocation47_spill] sm:$0xff] }
 0x39f   : > { %v1454_v29 = vmul.f32 1.442695, %v1338_v15 }
 0x3a0   : > { %v1195_v41 = vpop.xlane.xlu2 %1194 }
 0x3a1   : > { %v1288_v10 = vsub.f32 %v3595_v48, %v1195_v41  ;;  %v1289_v21 = vsub.f32 %v2786_v45, %v1195_v41  ;;  %1590 = vmatpush.xpose.msra.mxu3 %v2275_v20  ;;  %v1346_v45 = vsub.f32 %v3597_v12, %v3234_v36  ;;  %v1342_v36 = vsub.f32 %v3599_v13, %v3277_v3  ;;  %v3604_v41 = vld [vmem:[#allocation56_spill] sm:$0xff]  ;;  %v3608_v12 = vld [vmem:[#allocation53_spill] sm:$0xff] }
 0x3a2   : > { %v1336_v20 = vsub.f32 %v3604_v41, %v3250_v43  ;;  %v1337_v48 = vsub.f32 %v2932_v28, %v3250_v43  ;;  %v1446_v28 = vmul.f32 1.442695, %v1334_v2  ;;  %v3607_v43 = vld [vmem:[#allocation52_spill] sm:$0xff]  ;;  %v3616_v41 = vld [vmem:[#allocation43_spill] sm:$0xff] }
 0x3a3   : > { %v2277_v32 = vpop.eup %2276  ;;  %v1354_v6 = vmul.f32 1.442695, %v1288_v10  ;;  %v1356_v56 = vmul.f32 1.442695, %v1289_v21  ;;  %v1470_v5 = vmul.f32 1.442695, %v1346_v45  ;;  %v1333_v45 = vsub.f32 %v3608_v12, %v3293_v38 }
 0x3a4   : > { %1571 = vmatpush.xpose.msra.mxu2 %v2277_v32  ;;  %v2279_v33 = vpop.eup %2278  ;;  %v1462_v54 = vmul.f32 1.442695, %v1342_v36  ;;  %v1456_v10 = vmul.f32 1.442695, %v1339_v16  ;;  %v1450_v47 = vmul.f32 1.442695, %v1336_v20 }
 0x3a5   : > { %2280 = vpow2.f32 %v1354_v6  ;;  %1591 = vmatpush.xpose.msra.mxu3 %v2279_v33  ;;  %v1452_v32 = vmul.f32 1.442695, %v1337_v48  ;;  %v1335_v6 = vsub.f32 %v3606_v30, %v3283_v52  ;;  %v1332_v33 = vsub.f32 %v3607_v43, %v3293_v38 }
 0x3a6   : > { %2282 = vpow2.f32 %v1356_v56  ;;  %v1438_v38 = vmul.f32 1.442695, %v1330_v49 }
 0x3a7   : > { %2284 = vpow2.f32 %v1350_v58  ;;  %v1442_v52 = vmul.f32 1.442695, %v1332_v33  ;;  %v3618_v33 = vld [vmem:[#allocation39_spill] sm:$0xff] }
 0x3a8   : > { %2286 = vpow2.f32 %v1352_v61  ;;  %v1448_v61 = vmul.f32 1.442695, %v1335_v6 }
 0x3a9   : > { %2288 = vpow2.f32 %v1474_v11  ;;  %v1252_v11 = vpop.xlane.xlu0 %1251 }
 0x3aa   : > { %2290 = vpow2.f32 %v1476_v26 }
 0x3ab   : > { %v2281_v23 = vpop.eup %2280  ;;  %2292 = vpow2.f32 %v1470_v5  ;;  %v1444_v5 = vmul.f32 1.442695, %v1333_v45 }
 0x3ac   : > { %v2283_v37 = vpop.eup %2282  ;;  %1572 = vmatpush.xpose.msra.mxu2 %v2281_v23  ;;  %2294 = vpow2.f32 %v1472_v60  ;;  %v3610_v23 = vld [vmem:[#allocation51_spill] sm:$0xff] }
 0x3ad   : > { %1592 = vmatpush.xpose.msra.mxu3 %v2283_v37  ;;  %v2285_v24 = vpop.eup %2284  ;;  %2296 = vpow2.f32 %v1466_v53  ;;  %v1331_v50 = vsub.f32 %v3610_v23, %v3307_v7  ;;  %v1329_v53 = vsub.f32 %v3582_v18, %v1255_v9  ;;  %v3614_v18 = vld [vmem:[#allocation44_spill] sm:$0xff] }
 0x3ae   : > { %v2287_v14 = vpop.eup %2286  ;;  %2298 = vpow2.f32 %v1468_v44 }
 0x3af   : > { %v2289_v35 = vpop.eup %2288  ;;  %2300 = vpow2.f32 %v1462_v54  ;;  %v1440_v36 = vmul.f32 1.442695, %v1331_v50  ;;  %v1436_v22 = vmul.f32 1.442695, %v1329_v53  ;;  %v1327_v54 = vsub.f32 %v3613_v62, %v1252_v11 }
 0x3b0   : > { %1573 = vmatpush.xpose.msra.mxu2 %v2285_v24  ;;  %v2291_v27 = vpop.eup %2290  ;;  %2302 = vpow2.f32 %v1464_v1  ;;  %v3611_v24 = vld [vmem:[#allocation48_spill] sm:$0xff] }
 0x3b1   : > { %1593 = vmatpush.xpose.msra.mxu3 %v2287_v14  ;;  %v2293_v3 = vpop.eup %2292  ;;  %2304 = vpow2.f32 %v1458_v51  ;;  %v1328_v13 = vsub.f32 %v3611_v24, %v1255_v9  ;;  %v1249_v44 = vpop.xlane.xlu0 %1248  ;;  %v1432_v15 = vmul.f32 1.442695, %v1327_v54  ;;  %v1650_v24 = vld [vmem:[%s3419_s6] sm:$0xf] }
 0x3b2   : > { %v2295_v63 = vpop.eup %2294  ;;  %2306 = vpow2.f32 %v1460_v59  ;;  %v1324_v34 = vsub.f32 %v3614_v18, %v1249_v44  ;;  %v1325_v51 = vsub.f32 %v3585_v55, %v1249_v44  ;;  %v3617_v55 = vld [vmem:[#allocation40_spill] sm:$0xff] }
 0x3b3   : > { %1574 = vmatmul.f32.vlgmr.msra.gmra.mxu2 %v3601_v31  ;;  %v2297_v40 = vpop.eup %2296  ;;  %2308 = vpow2.f32 %v1454_v29 }
 0x3b4   : > { %1598 = vmatpush.xpose.msrb.mxu2 %v2289_v35  ;;  %1594 = vmatmul.f32.vlgmr.msra.gmra.mxu3 %v3602_v39  ;;  %v2299_v4 = vpop.eup %2298  ;;  %2310 = vpow2.f32 %v1456_v10  ;;  %v1434_v35 = vmul.f32 1.442695, %v1328_v13  ;;  %v1426_v9 = vmul.f32 1.442695, %v1324_v34  ;;  %v1428_v29 = vmul.f32 1.442695, %v1325_v51 }
 0x3b5   : > { %1618 = vmatpush.xpose.msrb.mxu3 %v2291_v27  ;;  %v2301_v21 = vpop.eup %2300  ;;  %2312 = vpow2.f32 %v1450_v47  ;;  %v3612_v27 = vld [vmem:[#allocation46_spill] sm:$0xff] }
 0x3b6   : > { %v2303_v19 = vpop.eup %2302  ;;  %2314 = vpow2.f32 %v1452_v32  ;;  %v1326_v7 = vsub.f32 %v3612_v27, %v1252_v11 }
 0x3b7   : > { %v2305_v56 = vpop.eup %2304  ;;  %2316 = vpow2.f32 %v1446_v28 }
 0x3b8   : > { %1599 = vmatpush.xpose.msrb.mxu2 %v2293_v3  ;;  %v2307_v58 = vpop.eup %2306  ;;  %2318 = vpow2.f32 %v1448_v61  ;;  %v1246_v3 = vpop.xlane.xlu2 %1245 }
 0x3b9   : > { %1619 = vmatpush.xpose.msrb.mxu3 %v2295_v63  ;;  %v2309_v0 = vpop.eup %2308  ;;  %2320 = vpow2.f32 %v1442_v52  ;;  %v1430_v63 = vmul.f32 1.442695, %v1326_v7  ;;  %v1323_v20 = vsub.f32 %v3616_v41, %v1246_v3  ;;  %v1243_v48 = vpop.xlane.xlu0 %1242 }
 0x3ba   : > { %v2311_v26 = vpop.eup %2310  ;;  %2322 = vpow2.f32 %v1444_v5  ;;  %v1320_v2 = vsub.f32 %v3617_v55, %v1243_v48  ;;  %v1321_v30 = vsub.f32 %v3587_v25, %v1243_v48 }
 0x3bb   : > { %v2313_v60 = vpop.eup %2312  ;;  %2324 = vpow2.f32 %v1438_v38  ;;  %v1424_v32 = vmul.f32 1.442695, %v1323_v20 }
 0x3bc   : > { %1600 = vmatpush.xpose.msrb.mxu2 %v2297_v40  ;;  %v2315_v37 = vpop.eup %2314  ;;  %2326 = vpow2.f32 %v1440_v36  ;;  %v3615_v40 = vld [vmem:[#allocation42_spill] sm:$0xff]  ;;  %v1418_v43 = vmul.f32 1.442695, %v1320_v2  ;;  %v1420_v12 = vmul.f32 1.442695, %v1321_v30 }
 0x3bd   : > { %1620 = vmatpush.xpose.msrb.mxu3 %v2299_v4  ;;  %v2317_v14 = vpop.eup %2316  ;;  %2328 = vpow2.f32 %v1434_v35  ;;  %v1322_v4 = vsub.f32 %v3615_v40, %v1246_v3  ;;  %v3619_v40 = vld [vmem:[#allocation19_spill] sm:$0xff] }
 0x3be   : > { %v2319_v57 = vpop.eup %2318  ;;  %2330 = vpow2.f32 %v1436_v22 }
 0x3bf   : > { %v2321_v42 = vpop.eup %2320  ;;  %2332 = vpow2.f32 %v1430_v63  ;;  %v1422_v8 = vmul.f32 1.442695, %v1322_v4 }
 0x3c0   : > { %1601 = vmatpush.xpose.msrb.mxu2 %v2301_v21  ;;  %v2323_v1 = vpop.eup %2322  ;;  %2334 = vpow2.f32 %v1432_v15  ;;  %v1240_v6 = vpop.xlane.xlu2 %1239 }
 0x3c1   : > { %1621 = vmatpush.xpose.msrb.mxu3 %v2303_v19  ;;  %v2325_v16 = vpop.eup %2324  ;;  %2336 = vpow2.f32 %v1426_v9  ;;  %v1318_v61 = vsub.f32 %v3618_v33, %v1240_v6  ;;  %v1319_v45 = vsub.f32 %v2896_v46, %v1240_v6  ;;  %v1655_v63 = vpop.permute.xlu0 %1654 }
 0x3c2   : > { %v2327_v59 = vpop.eup %2326  ;;  %2338 = vpow2.f32 %v1428_v29 }
 0x3c3   : > { %v2329_v10 = vpop.eup %2328  ;;  %2340 = vpow2.f32 %v1422_v8  ;;  %v1414_v25 = vmul.f32 1.442695, %v1318_v61  ;;  %v1416_v52 = vmul.f32 1.442695, %v1319_v45 }
 0x3c4   : > { %1602 = vmatpush.xpose.msrb.mxu2 %v2305_v56  ;;  %v2331_v47 = vpop.eup %2330  ;;  %2342 = vpow2.f32 %v1424_v32 }
 0x3c5   : > { %1622 = vmatpush.xpose.msrb.mxu3 %v2307_v58  ;;  %v1495_v21 = vpop.f32.mrf.mxu2  ;;  %v2333_v58 = vpop.eup %2332 }
 0x3c6   : > { %v2335_v28 = vpop.eup %2334 }
 0x3c7   : > { %v2337_v11 = vpop.eup %2336 }
 0x3c8   : > { %1603 = vmatpush.xpose.msrb.mxu2 %v2309_v0  ;;  %v2339_v0 = vpop.eup %2338 }
 0x3c9   : > { %1623 = vmatpush.xpose.msrb.mxu3 %v2311_v26  ;;  %v2341_v26 = vpop.eup %2340 }
 0x3ca   : > { %v2343_v17 = vpop.eup %2342 }
 0x3cc   : > { %1604 = vmatpush.xpose.msrb.mxu2 %v2313_v60 }
 0x3cd   : > { %1624 = vmatpush.xpose.msrb.mxu3 %v2315_v37 }
 0x3d0   : > { %1605 = vmatpush.xpose.msrb.mxu2 %v2317_v14 }
 0x3d1   : > { %1625 = vmatpush.xpose.msrb.mxu3 %v2319_v57 }
 0x3d2   : > { %v1515_v19 = vpop.f32.mrf.mxu3 }
 0x3d3   : > { %v1516_v56 = vadd.f32 %v1515_v19, %v1495_v21 }
 0x3d4   : > { %1606 = vmatpush.xpose.msrb.mxu2 %v2321_v42 }
 0x3d5   : > { %1626 = vmatpush.xpose.msrb.mxu3 %v2323_v1  ;;  %2344 = vrcp.f32 %v1516_v56 }
 0x3d6   : > { %2346 = vpow2.f32 %v1418_v43 }
 0x3d7   : > { %2348 = vpow2.f32 %v1420_v12 }
 0x3d8   : > { %1607 = vmatpush.xpose.msrb.mxu2 %v2325_v16  ;;  %2350 = vpow2.f32 %v1414_v25 }
 0x3d9   : > { %1627 = vmatpush.xpose.msrb.mxu3 %v2327_v59  ;;  %2352 = vpow2.f32 %v1416_v52 }
 0x3db   : > { %v2345_v49 = vpop.eup %2344 }
 0x3dc   : > { %1608 = vmatpush.xpose.msrb.mxu2 %v2329_v10  ;;  %v2347_v5 = vpop.eup %2346  ;;  %v1640_v23 = vperm.slane %v2345_v49, 2 }
 0x3dd   : > { %1628 = vmatpush.xpose.msrb.mxu3 %v2331_v47  ;;  %v2349_v50 = vpop.eup %2348 }
 0x3de   : > { %v2351_v46 = vpop.eup %2350  ;;  %v1642_v60 = vmul.f32 %v1640_v23, %v1516_v56 }
 0x3df   : > { %v2353_v37 = vpop.eup %2352 }
 0x3e0   : > { %1609 = vmatpush.xpose.msrb.mxu2 %v2333_v58 }
 0x3e1   : > { %1629 = vmatpush.xpose.msrb.mxu3 %v2335_v28 }
 0x3e4   : > { %1610 = vmatpush.xpose.msrb.mxu2 %v2337_v11 }
 0x3e5   : > { %1630 = vmatpush.xpose.msrb.mxu3 %v2339_v0  ;;  %v1535_v38 = vpop.f32.mrf.mxu2 }
 0x3e8   : > { %1611 = vmatpush.xpose.msrb.mxu2 %v2341_v26 }
 0x3e9   : > { %1631 = vmatpush.xpose.msrb.mxu3 %v2343_v17 }
 0x3ec   : > { %1612 = vmatpush.xpose.msrb.mxu2 %v2347_v5 }
 0x3ed   : > { %1632 = vmatpush.xpose.msrb.mxu3 %v2349_v50 }
 0x3f0   : > { %1613 = vmatpush.xpose.msrb.mxu2 %v2351_v46 }
 0x3f1   : > { %1633 = vmatpush.xpose.msrb.mxu3 %v2353_v37 }
 0x3f2   : > { %v1555_v13 = vpop.f32.mrf.mxu3 }
 0x3f3   : > { %1614 = vmatmul.f32.vlgmr.msrb.gmra.mxu2 %v3601_v31  ;;  %v1556_v36 = vadd.f32 %v1555_v13, %v1535_v38 }
 0x3f4   : > { %2017 = vmatpush.msk.msra.mxu2 %vm693_vm2, %v1642_v60  ;;  %1634 = vmatmul.f32.vlgmr.msrb.gmra.mxu3 %v3602_v39 }
 0x3f5   : > { %2354 = vrcp.f32 %v1556_v36 }
 0x3fb   : > { %2018 = vmatmul.msk.f32.vlgmr.msra.gmra.mxu2 %vm596_vm3, %v1650_v24  ;;  %v2355_v53 = vpop.eup %2354 }
 0x3fc   : > { %v1641_v14 = vperm.slane %v2355_v53, 2 }
 0x3fe   : > { %v1643_v57 = vmul.f32 %v1641_v14, %v1556_v36 }
 0x400   : > { %2019 = vmatpush.msk.msra.mxu3 %vm693_vm2, %v1643_v57 }
 0x401   : > { %2020 = vmatmul.msk.f32.vlgmr.msra.gmra.mxu3 %vm596_vm3, %v1650_v24 }
 0x436   : > { %v1575_v31 = vpop.f32.mrf.mxu2 }
 0x437   : > { %v1595_v44 = vpop.f32.mrf.mxu3 }
 0x438   : > { %v1596_v39 = vadd.f32 %v1595_v44, %v1575_v31 }
 0x43a   : > { %2356 = vrcp.f32 %v1596_v39 }
 0x440   : > { %v2357_v35 = vpop.eup %2356 }
 0x441   : > { %v1646_v27 = vperm.slane %v2357_v35, 2 }
 0x443   : > { %v1648_v7 = vmul.f32 %v1646_v27, %v1596_v39 }
 0x445   : > { %2021 = vmatpush.msk.msrb.mxu2 %vm693_vm2, %v1648_v7 }
 0x446   : > { %2022 = vmatmul.msk.f32.vlgmr.msrb.gmra.mxu2 %vm596_vm3, %v1650_v24 }
 0x476   : > { %v1615_v22 = vpop.f32.mrf.mxu2 }
 0x477   : > { %v1635_v62 = vpop.f32.mrf.mxu3 }
 0x478   : > { %v1636_v54 = vadd.f32 %v1635_v62, %v1615_v22 }
 0x47a   : > { %2358 = vrcp.f32 %v1636_v54 }
 0x47e   : > { %v1689_v18 = vpop.f32.mrf.mxu2 }
 0x47f   : > { %v1690_v51 = vadd.f32 %v1689_v18, %v1655_v63 }
 0x480   : > { %v2359_v42 = vpop.eup %2358 }
 0x481   : > { %v1647_v1 = vperm.slane %v2359_v42, 2 }
 0x483   : > { %v1649_v3 = vmul.f32 %v1647_v1, %v1636_v54 }
 0x484   : > { %v1709_v34 = vpop.f32.mrf.mxu3 }
 0x485   : > { %2023 = vmatpush.msk.msrb.mxu3 %vm693_vm2, %v1649_v3  ;;  %v1710_v15 = vadd.f32 %v1709_v34, %v1655_v63 }
 0x486   : > { %2024 = vmatmul.msk.f32.vlgmr.msrb.gmra.mxu3 %vm596_vm3, %v1650_v24 }
 0x487   : > { %v1754_v16 = vrot.slane %v1710_v15, 4 }
 0x489   : > { %v1755_v59 = vsel %vm419_vm0, %v1690_v51, %v1754_v16 }
 0x48a   : > { %v1757_v4 = vadd.f32 %v1755_v59, %v3619_v40 }
 0x48c   : > { %1758 = vst [vmem:[%s394_s19] sm:$0xff] %v1757_v4 }
 0x48d   : > { %2447 = shalt.err (!%p2444_p0)
}
 0x48e   : > { %2041 = dma.vmem_to_hbm [thread:$0]  (%p2625_p11), %s1786_s28, 128, %s1788_s11, %s1767_s15   ;;  %v3620_v21 = vld [vmem:[#allocation20_spill] sm:$0xff] }
 0x48f   : > { %s1798_s30 = scalar_lea.hbm %s3422_s9, %s2035_s22  ;;  %s401_s0 = scalar_lea.vmem [#allocation8], %s2692_s25 }
 0x490   : > { %s1800_s17 = sshll.u32 %s401_s0, 4  ;;  %s1802_s19 = sshll.u32 %s1798_s30, 4  ;;  %s1801_s17 = int_to_ptr.vmem [resolvable:$true] %s1800_s17  ;;  %s1803_s19 = int_to_ptr.hbm [resolvable:$true] %s1802_s19 }
 0x491   : > { %s1772_s28 = scalar_lea.sflag [#allocation9], %s2689_s23  ;;  %s2462_s11 = sshra.s32 %s1803_s19, 4  ;;  %s2463_s11 = int_to_ptr.hbm [resolvable:$true] %s2462_s11 }
 0x492   : > { %s2464_s15 = scalar_lea.hbm %s2463_s11, 8  ;;  %s2468_s25 = scalar_lea.hbm %s3422_s9, 16 }
 0x493   : > { %p2465_p1 = scmp.ne.s32.totalorder %s2463_s11, %s2464_s15  ;;  %p2469_p5 = scmp.lt.s32.totalorder %s2463_s11, %s3422_s9 }
 0x494   : > { %p2470_p8 = scmp.lt.s32.totalorder %s2468_s25, %s2464_s15 }
 0x495   : > { %p2466_p4 = pnand %p2465_p1, %p2625_p11 }
 0x496   : > { %p2471_p6 = por %p2470_p8, %p2469_p5 }
 0x497   : > { %p2467_p7 = pneg %p2466_p4 }
 0x499   : > { %p2472_p13 = pnand %p2471_p6, %p2467_p7 }
 0x4c9   : > { %v1729_v9 = vpop.f32.mrf.mxu2 }
 0x4ca   : > { %v1730_v29 = vadd.f32 %v1729_v9, %v1655_v63 }
 0x509   : > { %v1749_v41 = vpop.f32.mrf.mxu3 }
 0x50a   : > { %v1750_v20 = vadd.f32 %v1749_v41, %v1655_v63 }
 0x50c   : > { %v1761_v48 = vrot.slane %v1750_v20, 4 }
 0x50e   : > { %v1762_v10 = vsel %vm419_vm0, %v1730_v29, %v1761_v48 }
 0x50f   : > { %v1764_v19 = vadd.f32 %v1762_v10, %v3620_v21 }
 0x511   : > { %1765 = vst [vmem:[%s401_s0] sm:$0xff] %v1764_v19 }
 0x512   : > { %2475 = shalt.err (!%p2472_p13)
}
 0x513   : > { %2042 = dma.vmem_to_hbm [thread:$0]  (%p2625_p11), %s1801_s17, 128, %s1803_s19, %s1772_s28  }
 0x514 PF: > { %s3621_s23 = sld [smem:[#allocation14_spill]]  ;;  %p3623_p3 = scmp.ge.s32.totalorder %s2522_s12, 2 }
 0x516   : > { %p2053_p10 = pnand %p3623_p3, %p2629_p12 }
 0x518   : > { %p2054_p2 = pneg %p2053_p10 }
 0x51a   : > { %s1814_s18 = sand.u32 1, %s3621_s23  }
 0x51b   : > { %s1815_s29 = scalar_lea.sflag [#allocation4], %s1814_s18 }
 0x51c   : > { %2501 = dma.done.wait (%p2054_p2), %s1815_s29, 128  }
 0x51d   : > { %2503 = vsyncadd (%p2054_p2), %s1815_s29, 4294967168  ;;  %s1825_s16 = scalar_lea.sflag [#allocation9], %s1814_s18 }
 0x51e   : > { %2505 = dma.done.wait (%p2054_p2), %s1825_s16, 128  }
 0x51f   : > { %2507 = vsyncadd (%p2054_p2), %s1825_s16, 4294967168  ;;  %s3624_s12 = sld [smem:[#allocation16_spill]]  ;;  %s3627_s30 = smov %s2514_s10 }
 0x520   : > { %s3625_s26 = sld [smem:[#allocation15_spill]] }
 0x521   : > { %s3626_s11 = sld [smem:[#allocation17_spill]] }
 0x525   : > { %p29_p11 = scmp.ge.s32.totalorder %s3624_s12, 4  }
 0x526   : > { %s3628_s10 = smov %s3625_s26 }
 0x527   :  { %31 = sbr.rel (!%p29_p11) target bundleno = 11 (0xb), region = 127 }
 0x52c   :  { %1831 = vsyncpa [#allocation3], 1 }
 0x52d   :  { %1833 = vsyncpa [#allocation3 + $0x1], 1 }
 0x52e   :  { %1834 = vsyncpa [#allocation6], 1 }
 0x52f   :  { %1836 = vsyncpa [#allocation6 + $0x1], 1 }
 0x530   :  { %1837 = vsyncpa [#allocation4], 1 }
 0x531   :  { %1839 = vsyncpa [#allocation4 + $0x1], 1 }
 0x532   :  { %1840 = vsyncpa [#allocation9], 1 }
 0x533   :  { %1842 = vsyncpa [#allocation9 + $0x1], 1 }

</bundles_post_ra>
